<compile_context>
chip_gen: v6e
topology: v6e:2x2x1
jax: 0.10.0
libtpu: 0.0.40
codegen_flags: <defaults>
</compile_context>

<pallas_src>
import jax
import jax.numpy as jnp
from jax import lax
from jax.experimental import pallas as pl
from jax.experimental.pallas import tpu as pltpu


def _round_up(x, m):
    return ((x + m - 1) // m) * m


# ---------------------------------------------------------------------------
# Kernel
# ---------------------------------------------------------------------------
def _encoder_kernel(x_ref,               # (tile_n, in_dim)  compute dtype
                    wbd_ref, b0p_ref,    # [w0 0; 0 ws] : 2*in_dim -> 2*dim, bias [b0 | 0]
                    w1s_ref, b1_ref,     # [w1 ; I]     : 2*dim    -> dim
                    wh_ref, bh_ref,      # [wm | wl]    : dim      -> 2*out_dim, bias [bm | bl]
                    out_ref):            # (2*out_dim, tile_n) lane-dense transposed slab
    cdt = wbd_ref.dtype                  # matmul operand dtype (bf16 or f32)
    dim = w1s_ref.shape[1]

    x = x_ref[...]                                              # (T, in_dim)
    xx = jnp.concatenate([jnp.maximum(x, 0), x], axis=-1)       # (T, 2*in_dim)

    # Stage 1: fc_0(relu(x)) and shortcut(x) in one MXU stream (block-diag weights).
    z = jnp.dot(xx.astype(cdt), wbd_ref[...],
                preferred_element_type=jnp.float32) + b0p_ref[...]    # [net | x_s], f32

    # ReLU only on the `net` half (first `dim` lanes); leave x_s untouched.
    lane = lax.broadcasted_iota(jnp.int32, z.shape, 1)
    zz = jnp.where(lane < dim, jnp.maximum(z, 0.0), z)                # [relu(net) | x_s]

    # Stage 2: fc_1(relu(net)) + x_s (+ b1) in one MXU stream, then the final ReLU.
    h = jnp.maximum(
        jnp.dot(zz.astype(cdt), w1s_ref[...],
                preferred_element_type=jnp.float32) + b1_ref[...], 0.0)

    # Stage 3: both heads in one MXU stream; emit a transposed slab so the row
    # dimension lands on the 128-lane axis (unmasked vst writeback).
    y = jnp.dot(h.astype(cdt), wh_ref[...],
                preferred_element_type=jnp.float32) + bh_ref[...]     # (T, 2*out_dim)
    out_ref[...] = y.T.astype(out_ref.dtype)                          # (2*out_dim, T)


# ---------------------------------------------------------------------------
# Wrapper
# ---------------------------------------------------------------------------
def fuse_params(params, compute_dtype=jnp.bfloat16):
    """Build fused weight/bias tensors ONCE at parameter-load time."""
    in_dim, dim = params["w0"].shape
    out_dim = params["wm"].shape[1]

    wbd = jnp.zeros((2 * in_dim, 2 * dim), jnp.float32)
    wbd = wbd.at[:in_dim, :dim].set(params["w0"])
    wbd = wbd.at[in_dim:, dim:].set(params["ws"])

    return {
        "wbd": wbd.astype(compute_dtype),
        "b0p": jnp.concatenate([params["b0"], jnp.zeros((1, dim), jnp.float32)], axis=-1),
        "w1s": jnp.concatenate([params["w1"], jnp.eye(dim, dtype=jnp.float32)],
                               axis=0).astype(compute_dtype),
        "b1": params["b1"],
        "wh": jnp.concatenate([params["wm"], params["wl"]], axis=-1).astype(compute_dtype),
        "bh": jnp.concatenate([params["bm"], params["bl"]], axis=-1),
        "in_dim": in_dim, "dim": dim, "out_dim": out_dim,
        "compute_dtype": compute_dtype,
    }


def _choose_tile_n(n_rows, max_tile_n):
    """Biggest tile that (a) is a multiple of 128 (lane-dense transposed output,
    bf16 sublane packing), (b) stays under max_tile_n, and (c) leaves >= 2 grid
    steps whenever N allows so both v7x TensorCores get work."""
    if n_rows < 128:
        # Single block equal to the full array dims (legal via the
        # "block == full dim" rule); nothing to shard at this size.
        return n_rows
    return min(max_tile_n, _round_up(pl.cdiv(n_rows, 2), 128))


def latent_encoder(x, fused, *, max_tile_n=4096):
    """x: (N, in_dim) float32. Returns (mean, logstd), each (N, out_dim) float32.

    max_tile_n=4096 keeps the double-buffered footprint ~1 MiB — far under even
    v5e's 16 MiB scoped-VMEM default, so no vmem_limit_bytes override is needed.
    """
    N, in_dim = x.shape
    assert in_dim == fused["in_dim"]
    dim, out_dim = fused["dim"], fused["out_dim"]
    assert max_tile_n % 128 == 0

    tile_n = _choose_tile_n(N, max_tile_n)
    n_tiles = pl.cdiv(N, tile_n)

    # Input DMA moves the compute dtype (halves HBM->VMEM bytes for bf16).
    x_c = x.astype(fused["compute_dtype"])

    def full(shape):
        # Constant block index -> fetched once, stays resident in VMEM.
        return pl.BlockSpec(shape, lambda i: (0, 0))

    grid_spec = pltpu.PrefetchScalarGridSpec(
        num_scalar_prefetch=0,
        grid=(n_tiles,),
        in_specs=[
            pl.BlockSpec((tile_n, in_dim), lambda i: (i, 0)),
            full((2 * in_dim, 2 * dim)), full((1, 2 * dim)),
            full((2 * dim, dim)),        full((1, dim)),
            full((dim, 2 * out_dim)),    full((1, 2 * out_dim)),
        ],
        out_specs=pl.BlockSpec((2 * out_dim, tile_n), lambda i: (0, i)),
    )

    out_t = pl.pallas_call(
        _encoder_kernel,
        out_shape=jax.ShapeDtypeStruct((2 * out_dim, N), jnp.float32),
        grid_spec=grid_spec,
        compiler_params=pltpu.CompilerParams(
            dimension_semantics=("parallel",)),
    )(x_c, fused["wbd"], fused["b0p"], fused["w1s"], fused["b1"],
      fused["wh"], fused["bh"])

    out = out_t.T                               # (N, 2*out_dim)
    return out[:, :out_dim], out[:, out_dim:]


# ---------------------------------------------------------------------------
# Reference / test harness
# ---------------------------------------------------------------------------
def _reference(x, p):
    """Pure-JAX reference mirroring the PyTorch forward."""
    ax = jnp.maximum(x, 0.0)
    net = ax @ p["w0"] + p["b0"]
    dx = jnp.maximum(net, 0.0) @ p["w1"] + p["b1"]
    x_s = x @ p["ws"]
    h = jnp.maximum(x_s + dx, 0.0)
    return h @ p["wm"] + p["bm"], h @ p["wl"] + p["bl"]


def make_params(key, in_dim, dim, out_dim):
    ks = jax.random.split(key, 8)
    scale = 0.1
    return {
        "w0": scale * jax.random.normal(ks[0], (in_dim, dim), jnp.float32),
        "b0": scale * jax.random.normal(ks[1], (1, dim), jnp.float32),
        # NOTE: PyTorch ResnetBlockFC zero-inits fc_1.weight; we use small random
        # values here to exercise the full datapath deterministically.
        "w1": scale * jax.random.normal(ks[2], (dim, dim), jnp.float32),
        "b1": scale * jax.random.normal(ks[3], (1, dim), jnp.float32),
        "ws": scale * jax.random.normal(ks[4], (in_dim, dim), jnp.float32),
        "wm": scale * jax.random.normal(ks[5], (dim, out_dim), jnp.float32),
        "bm": scale * jax.random.normal(ks[6], (1, out_dim), jnp.float32),
        "wl": scale * jax.random.normal(ks[7], (dim, out_dim), jnp.float32),
        "bl": jnp.zeros((1, out_dim), jnp.float32),
    }


if __name__ == "__main__":
    in_dim, dim, out_dim = 16, 32, 8
    N = 1000  # flattened batch * points; exercises 2 tiles + a ragged edge block

    key = jax.random.PRNGKey(0)
    kx, kp = jax.random.split(key)
    x = jax.random.normal(kx, (N, in_dim), jnp.float32)
    params = make_params(kp, in_dim, dim, out_dim)
    ref_mean, ref_logstd = _reference(x, params)

    # f32 operand path: bit-tight check across multi-tile grid + ragged edge.
    fused_f32 = fuse_params(params, compute_dtype=jnp.float32)
    mean, logstd = latent_encoder(x, fused_f32)
    jax.block_until_ready((mean, logstd))
    assert mean.shape == (N, out_dim) and logstd.shape == (N, out_dim)
    assert jnp.allclose(mean, ref_mean, atol=1e-4, rtol=1e-4)
    assert jnp.allclose(logstd, ref_logstd, atol=1e-4, rtol=1e-4)

    # Default bf16 MXU-operand path (v6e/v7x fast path; f32 accumulation).
    fused_bf16 = fuse_params(params)
    mb, lb = latent_encoder(x, fused_bf16)
    jax.block_until_ready((mb, lb))
    assert jnp.allclose(mb, ref_mean, atol=5e-2, rtol=5e-2)
    assert jnp.allclose(lb, ref_logstd, atol=5e-2, rtol=5e-2)

    # Small / ragged N (single block equal to full array dims, no padding copy).
    Nr = 100
    mr, lr = latent_encoder(x[:Nr], fused_f32)
    jax.block_until_ready((mr, lr))
    assert jnp.allclose(mr, ref_mean[:Nr], atol=1e-4, rtol=1e-4)
    assert jnp.allclose(lr, ref_logstd[:Nr], atol=1e-4, rtol=1e-4)

    print("KERNEL_OK")
</pallas_src>

<mosaic_0001>
module attributes {stable_mosaic.version = 11 : i64} {
  func.func @_encoder_kernel(%arg0: i32, %arg1: memref<512x16xf32, #tpu.memory_space<vmem>>, %arg2: memref<32x64xf32, #tpu.memory_space<vmem>>, %arg3: memref<1x64xf32, #tpu.memory_space<vmem>>, %arg4: memref<64x32xf32, #tpu.memory_space<vmem>>, %arg5: memref<1x32xf32, #tpu.memory_space<vmem>>, %arg6: memref<32x16xf32, #tpu.memory_space<vmem>>, %arg7: memref<1x16xf32, #tpu.memory_space<vmem>>, %arg8: memref<16x512xf32, #tpu.memory_space<vmem>>) attributes {dimension_semantics = [#tpu.dimension_semantics<parallel>], iteration_bounds = array<i64: 2>, scalar_prefetch = 0 : i64, scratch_operands = 0 : i64, tpu.core_type = #tpu.core_type<tc>, window_params = [{transform_indices = @transform_0, window_bounds = array<i64: 512, 16>}, {pipeline_mode = #tpu.pipeline_mode<synchronous>, transform_indices = @transform_1, window_bounds = array<i64: 32, 64>}, {pipeline_mode = #tpu.pipeline_mode<synchronous>, transform_indices = @transform_2, window_bounds = array<i64: 1, 64>}, {pipeline_mode = #tpu.pipeline_mode<synchronous>, transform_indices = @transform_3, window_bounds = array<i64: 64, 32>}, {pipeline_mode = #tpu.pipeline_mode<synchronous>, transform_indices = @transform_4, window_bounds = array<i64: 1, 32>}, {pipeline_mode = #tpu.pipeline_mode<synchronous>, transform_indices = @transform_5, window_bounds = array<i64: 32, 16>}, {pipeline_mode = #tpu.pipeline_mode<synchronous>, transform_indices = @transform_6, window_bounds = array<i64: 1, 16>}, {transform_indices = @transform_7, window_bounds = array<i64: 16, 512>}]} {
    %c0 = arith.constant 0 : index
    %c0_0 = arith.constant 0 : index
    %0 = vector.load %arg1[%c0, %c0_0] : memref<512x16xf32, #tpu.memory_space<vmem>>, vector<512x16xf32>
    %cst = arith.constant 0.000000e+00 : f32
    %1 = vector.broadcast %cst : f32 to vector<512x16xf32>
    %2 = arith.maximumf %0, %1 : vector<512x16xf32>
    %3 = tpu.concatenate %2, %0 in 1 : vector<512x16xf32>, vector<512x16xf32> -> vector<512x32xf32>
    %c0_1 = arith.constant 0 : index
    %c0_2 = arith.constant 0 : index
    %4 = vector.load %arg2[%c0_1, %c0_2] : memref<32x64xf32, #tpu.memory_space<vmem>>, vector<32x64xf32>
    %cst_3 = arith.constant dense<0.000000e+00> : vector<512x64xf32>
    %5 = tpu.matmul %3, %4, %cst_3 {dimension_numbers = #tpu.dot_dimension_numbers<[1], [0], [0], [1], [0, 0, 1, 1], [], []>} : vector<512x32xf32>, vector<32x64xf32>, vector<512x64xf32> -> vector<512x64xf32>
    %c0_4 = arith.constant 0 : index
    %c0_5 = arith.constant 0 : index
    %6 = vector.load %arg3[%c0_4, %c0_5] : memref<1x64xf32, #tpu.memory_space<vmem>>, vector<1x64xf32>
    %7 = vector.broadcast %6 : vector<1x64xf32> to vector<512x64xf32>
    %8 = arith.addf %5, %7 : vector<512x64xf32>
    %9 = tpu.iota {dimensions = array<i32: 1>} : vector<512x64xi32>
    %c32_i32 = arith.constant 32 : i32
    %10 = vector.broadcast %c32_i32 : i32 to vector<512x64xi32>
    %11 = arith.cmpi slt, %9, %10 : vector<512x64xi32>
    %cst_6 = arith.constant 0.000000e+00 : f32
    %12 = vector.broadcast %cst_6 : f32 to vector<512x64xf32>
    %13 = arith.maximumf %8, %12 : vector<512x64xf32>
    %14 = arith.select %11, %13, %8 : vector<512x64xi1>, vector<512x64xf32>
    %c0_7 = arith.constant 0 : index
    %c0_8 = arith.constant 0 : index
    %15 = vector.load %arg4[%c0_7, %c0_8] : memref<64x32xf32, #tpu.memory_space<vmem>>, vector<64x32xf32>
    %cst_9 = arith.constant dense<0.000000e+00> : vector<512x32xf32>
    %16 = tpu.matmul %14, %15, %cst_9 {dimension_numbers = #tpu.dot_dimension_numbers<[1], [0], [0], [1], [0, 0, 1, 1], [], []>} : vector<512x64xf32>, vector<64x32xf32>, vector<512x32xf32> -> vector<512x32xf32>
    %c0_10 = arith.constant 0 : index
    %c0_11 = arith.constant 0 : index
    %17 = vector.load %arg5[%c0_10, %c0_11] : memref<1x32xf32, #tpu.memory_space<vmem>>, vector<1x32xf32>
    %18 = vector.broadcast %17 : vector<1x32xf32> to vector<512x32xf32>
    %19 = arith.addf %16, %18 : vector<512x32xf32>
    %cst_12 = arith.constant 0.000000e+00 : f32
    %20 = vector.broadcast %cst_12 : f32 to vector<512x32xf32>
    %21 = arith.maximumf %19, %20 : vector<512x32xf32>
    %c0_13 = arith.constant 0 : index
    %c0_14 = arith.constant 0 : index
    %22 = vector.load %arg6[%c0_13, %c0_14] : memref<32x16xf32, #tpu.memory_space<vmem>>, vector<32x16xf32>
    %cst_15 = arith.constant dense<0.000000e+00> : vector<512x16xf32>
    %23 = tpu.matmul %21, %22, %cst_15 {dimension_numbers = #tpu.dot_dimension_numbers<[1], [0], [0], [1], [0, 0, 1, 1], [], []>} : vector<512x32xf32>, vector<32x16xf32>, vector<512x16xf32> -> vector<512x16xf32>
    %c0_16 = arith.constant 0 : index
    %c0_17 = arith.constant 0 : index
    %24 = vector.load %arg7[%c0_16, %c0_17] : memref<1x16xf32, #tpu.memory_space<vmem>>, vector<1x16xf32>
    %25 = vector.broadcast %24 : vector<1x16xf32> to vector<512x16xf32>
    %26 = arith.addf %23, %25 : vector<512x16xf32>
    %27 = tpu.transpose %26, [1, 0] : vector<512x16xf32> -> vector<16x512xf32>
    %c0_18 = arith.constant 0 : index
    %c0_19 = arith.constant 0 : index
    %28 = vector.load %arg8[%c0_18, %c0_19] : memref<16x512xf32, #tpu.memory_space<vmem>>, vector<16x512xf32>
    tpu.vector_store %arg8[%c0_18, %c0_19], %27 {strides = array<i32>} : memref<16x512xf32, #tpu.memory_space<vmem>>, vector<16x512xf32>,
    return
  }
  func.func @transform_0(%arg0: i32) -> (i32, i32) {
    %c0_i32 = arith.constant 0 : i32
    %c0_i32_0 = arith.constant 0 : i32
    return %arg0, %c0_i32 : i32, i32
  }
  func.func @transform_1(%arg0: i32) -> (i32, i32) {
    %c0_i32 = arith.constant 0 : i32
    %c0_i32_0 = arith.constant 0 : i32
    %c0_i32_1 = arith.constant 0 : i32
    return %c0_i32, %c0_i32_0 : i32, i32
  }
  func.func @transform_2(%arg0: i32) -> (i32, i32) {
    %c0_i32 = arith.constant 0 : i32
    %c0_i32_0 = arith.constant 0 : i32
    %c0_i32_1 = arith.constant 0 : i32
    return %c0_i32, %c0_i32_0 : i32, i32
  }
  func.func @transform_3(%arg0: i32) -> (i32, i32) {
    %c0_i32 = arith.constant 0 : i32
    %c0_i32_0 = arith.constant 0 : i32
    %c0_i32_1 = arith.constant 0 : i32
    return %c0_i32, %c0_i32_0 : i32, i32
  }
  func.func @transform_4(%arg0: i32) -> (i32, i32) {
    %c0_i32 = arith.constant 0 : i32
    %c0_i32_0 = arith.constant 0 : i32
    %c0_i32_1 = arith.constant 0 : i32
    return %c0_i32, %c0_i32_0 : i32, i32
  }
  func.func @transform_5(%arg0: i32) -> (i32, i32) {
    %c0_i32 = arith.constant 0 : i32
    %c0_i32_0 = arith.constant 0 : i32
    %c0_i32_1 = arith.constant 0 : i32
    return %c0_i32, %c0_i32_0 : i32, i32
  }
  func.func @transform_6(%arg0: i32) -> (i32, i32) {
    %c0_i32 = arith.constant 0 : i32
    %c0_i32_0 = arith.constant 0 : i32
    %c0_i32_1 = arith.constant 0 : i32
    return %c0_i32, %c0_i32_0 : i32, i32
  }
  func.func @transform_7(%arg0: i32) -> (i32, i32) {
    %c0_i32 = arith.constant 0 : i32
    %c0_i32_0 = arith.constant 0 : i32
    return %c0_i32, %arg0 : i32, i32
  }
}

</mosaic_0001>

<bundles_post_ra>
// kernel: tpu_custom_call.1
= control target key start
LH: loop header
LB: loop body
LE: loop exit
PB: predicated region body
PF: predicated region fallthrough
CT: control target
= control target key end

     0   :  { %12 = vsyncpa [#allocation3], 0  ;;  %s4968_s0 = inlined_call_operand.vmem [shape: f32[1000,16], index: 0, kind: input, shape index: {}]   ;;  %s4969_s1 = inlined_call_operand.vmem [shape: f32[32,64], index: 1, kind: input, shape index: {}]   ;;  %s4970_s2 = inlined_call_operand.vmem [shape: f32[1,64], index: 2, kind: input, shape index: {}]   ;;  %s4971_s3 = inlined_call_operand.vmem [shape: f32[64,32], index: 3, kind: input, shape index: {}]   ;;  %s4972_s4 = inlined_call_operand.vmem [shape: f32[1,32], index: 4, kind: input, shape index: {}]   ;;  %s4973_s5 = inlined_call_operand.vmem [shape: f32[32,16], index: 5, kind: input, shape index: {}]   ;;  %s4974_s6 = inlined_call_operand.vmem [shape: f32[1,16], index: 6, kind: input, shape index: {}]   ;;  %s4975_s7 = inlined_call_operand.hbm [shape: f32[16,1000], index: 7, kind: output, shape index: {}]  }
   0x1   :  { %14 = vsyncpa [#allocation3 + $0x1], 0  ;;  %s3820_s24 = smov 0   ;;  %s3822_s25 = smov 0  }
   0x2   :  { %s3824_s26 = smov 0   ;;  %s3826_s27 = smov 0  }
   0x3 LB: > { %s3841_s28 = sadd.s32 4294967295, %s3773_s27   ;;  %s2926_s29 = sadd.s32 4294967294, %s3773_s27   ;;  %s3773_s27 = sphi %s3826_s27, %s5002_s27   ;;  %s3769_s26 = sphi %s3824_s26, %s5001_s26   ;;  %s3765_s25 = sphi %s3822_s25, %s5000_s25   ;;  %s3761_s24 = sphi %s3820_s24, %s4999_s24  }
   0x4   : > { %s3845_s30 = sadd.s32 1, %s3773_s27   ;;  %s179_s8 = sadd.s32 1, %s3769_s26 }
   0x5   : > { %s176_s9 = ssub.s32 %s3773_s27, %s3845_s30  ;;  %p189_p0 = scmp.ne.s32.totalorder %s3769_s26, %s3765_s25 }
   0x6   : > { %p177_p1 = scmp.eq.s32.totalorder %s176_s9, 0  ;;  %p190_p2 = scmp.eq.s32.totalorder %s3841_s28, 1 }
   0x7   : > { %p195_p3 = scmp.ne.s32.totalorder %s3765_s25, %s3761_s24  ;;  %p196_p4 = scmp.eq.s32.totalorder %s2926_s29, 1 }
   0x8   : > { %s3856_s10 = scalar_select %p177_p1, %s3769_s26, %s179_s8  }
   0x9   : > { %p3858_p5 = por %p190_p2, %p189_p0  ;;  %p3862_p6 = por %p196_p4, %p195_p3 }
   0xa   : > { %p2929_p7 = scmp.ge.s32.totalorder %s3773_s27, 1  ;;  %p249_p8 = scmp.lt.s32.totalorder %s3773_s27, 3 }
   0xc   : > { %p250_p9 = pnand %p2929_p7, %p249_p8 }
   0xe   : > { %253 = sbr.rel (%p250_p9) target bundleno = 985 (0x3d9), region = 48 }
  0x13   : > { %s2931_s13 = sshll.u32 %s3841_s28, 6  ;;  %v752_v0 = vld [vmem:[%s4969_s1 + $0x18] sm:$0xff]  ;;  %v751_v1 = vld [vmem:[%s4969_s1 + $0x10] sm:$0xff]  ;;  %v750_v2 = vld [vmem:[%s4969_s1 + $0x8] sm:$0xff]  ;;  %s3775_s9 = smov 16   ;;  %vm684_vm0 = vcmask 130048  }
  0x14   : > { %p290_p10 = scmp.lt.s32.totalorder %s2931_s13, 124  ;;  %3342 = vmatprep.subr.mxu0 %v752_v0  ;;  %3662 = vmatprep.subr.mxu1 %v752_v0  ;;  %v749_v3 = vld [vmem:[%s4969_s1] sm:$0xff]  ;;  %v4175_v62 = vld [vmem:[%s4971_s3 + $0x38] sm:$0xff]  ;;  %vm760_vm1 = vcmask 261120   ;;  %vm1484_vm3 = vcmask 523264   ;;  %s282_s15 = sand.u32 1, %s3765_s25  }
  0x15   : > { %3343 = vmatpush3.msra.mxu0 %v752_v0  ;;  %3666 = vmatpush3.msra.mxu1 %v752_v0  ;;  %s2930_s16 = sshll.u32 %s282_s15, 6  ;;  %s3133_s19 = sshll.u32 %s3841_s28, 9 }
  0x16   : > { %s5004_s13 = smov (!%p290_p10, %s2931_s13), 124  ;;  %3344 = vmatprep.subr.mxu0 %v751_v1  ;;  %3663 = vmatprep.subr.mxu1 %v751_v1  ;;  %s4899_s17 = scalar_lea.vmem [#allocation2], %s2930_s16 }
  0x17   : > { %3345 = vmatpush3.msra.mxu0 %v751_v1  ;;  %3667 = vmatpush3.msra.mxu1 %v751_v1  ;;  %s2932_s22 = sshll.u32 %s5004_s13, 3  ;;  %s2864_s18 = sshll.u32 %s4899_s17, 4  ;;  %s4917_s18 = int_to_ptr.vmem [resolvable:$true] %s2864_s18 }
  0x18   : > { %3346 = vmatprep.subr.mxu0 %v750_v2  ;;  %3664 = vmatprep.subr.mxu1 %v750_v2  ;;  %s3884_s8 = scalar_lea.vmem %s4968_s0, %s2932_s22  ;;  %s4923_s22 = scalar_lea.hbm %s4975_s7, %s3133_s19 }
  0x19   : > { %3347 = vmatpush3.msra.mxu0 %v750_v2  ;;  %3668 = vmatpush3.msra.mxu1 %v750_v2  ;;  %v3887_v4 = vld [vmem:[%s3884_s8] sm:$0xff]  ;;  %v3890_v5 = vld [vmem:[%s3884_s8 + $0x10] sm:$0xff]  ;;  %v3897_v6 = vld [vmem:[%s3884_s8 + $0x8] sm:$0xff]  ;;  %s4928_s23 = scalar_lea.sflag [#allocation3], %s282_s15  ;;  %s3713_s29 = scalar_lea.vmem %s4917_s18, 1024 }
  0x1a   : > { %3348 = vmatprep.subr.mxu0 %v749_v3  ;;  %3665 = vmatprep.subr.mxu1 %v749_v3  ;;  %v3900_v7 = vld [vmem:[%s3884_s8 + $0x18] sm:$0xff]  ;;  %v3907_v8 = vld [vmem:[%s3884_s8 + $0x20] sm:$0xff]  ;;  %v3910_v9 = vld [vmem:[%s3884_s8 + $0x28] sm:$0xff]  ;;  %v364_v63 = vmax.f32 %v3887_v4, 0.0  ;;  %v366_v1 = vmax.f32 %v3890_v5, 0.0  ;;  %p3714_p11 = scmp.ne.s32.totalorder %s4917_s18, %s3713_s29  ;;  %s3776_s28 = smov [#allocation2]  }
  0x1b   : > { %492 = vrot.lane.b32.xlu0 %v3887_v4, %s3775_s9  ;;  %496 = vrot.lane.b32.xlu1 %v3890_v5, %s3775_s9  ;;  %v3917_v10 = vld [vmem:[%s3884_s8 + $0x30] sm:$0xff]  ;;  %v3920_v11 = vld [vmem:[%s3884_s8 + $0x38] sm:$0xff]  ;;  %v365_v4 = vmax.f32 %v3897_v6, 0.0 }
  0x1c   : > { %3349 = vmatpush3.msra.mxu0 %v749_v3  ;;  %3669 = vmatpush3.msra.mxu1 %v749_v3  ;;  %v3927_v12 = vld [vmem:[%s3884_s8 + $0x40] sm:$0xff]  ;;  %v3930_v13 = vld [vmem:[%s3884_s8 + $0x48] sm:$0xff]  ;;  %v3937_v14 = vld [vmem:[%s3884_s8 + $0x50] sm:$0xff]  ;;  %p3715_p12 = pnand %p3714_p11, %p3858_p5 }
  0x1d   : > { %v3940_v15 = vld [vmem:[%s3884_s8 + $0x58] sm:$0xff]  ;;  %v3947_v16 = vld [vmem:[%s3884_s8 + $0x60] sm:$0xff]  ;;  %v3950_v17 = vld [vmem:[%s3884_s8 + $0x68] sm:$0xff]  ;;  %3446 = vmatprep.subr.mxu1 %v4175_v62 }
  0x1e   : > { %v3957_v18 = vld [vmem:[%s3884_s8 + $0x70] sm:$0xff]  ;;  %v3960_v19 = vld [vmem:[%s3884_s8 + $0x78] sm:$0xff]  ;;  %v3967_v20 = vld [vmem:[%s3884_s8 + $0x80] sm:$0xff]  ;;  %p3716_p13 = pneg %p3715_p12 }
  0x1f   : > { %494 = vrot.lane.b32.xlu0 %v3897_v6, %s3775_s9  ;;  %498 = vrot.lane.b32.xlu1 %v3900_v7, %s3775_s9  ;;  %v3970_v21 = vld [vmem:[%s3884_s8 + $0x88] sm:$0xff]  ;;  %v3977_v22 = vld [vmem:[%s3884_s8 + $0x90] sm:$0xff] }
  0x20   : > { %v3980_v23 = vld [vmem:[%s3884_s8 + $0x98] sm:$0xff]  ;;  %v3987_v24 = vld [vmem:[%s3884_s8 + $0xa0] sm:$0xff]  ;;  %v3990_v25 = vld [vmem:[%s3884_s8 + $0xa8] sm:$0xff] }
  0x21   : > { %v3997_v26 = vld [vmem:[%s3884_s8 + $0xb0] sm:$0xff]  ;;  %v4000_v27 = vld [vmem:[%s3884_s8 + $0xb8] sm:$0xff]  ;;  %v4007_v28 = vld [vmem:[%s3884_s8 + $0xc0] sm:$0xff] }
  0x22   : > { %v4010_v29 = vld [vmem:[%s3884_s8 + $0xc8] sm:$0xff]  ;;  %v4017_v30 = vld [vmem:[%s3884_s8 + $0xd0] sm:$0xff]  ;;  %v4020_v31 = vld [vmem:[%s3884_s8 + $0xd8] sm:$0xff] }
  0x23   : > { %500 = vrot.lane.b32.xlu0 %v3907_v8, %s3775_s9  ;;  %502 = vrot.lane.b32.xlu1 %v3910_v9, %s3775_s9  ;;  %v4027_v32 = vld [vmem:[%s3884_s8 + $0xe0] sm:$0xff]  ;;  %v4030_v33 = vld [vmem:[%s3884_s8 + $0xe8] sm:$0xff] }
  0x24   : > { %v4037_v34 = vld [vmem:[%s3884_s8 + $0xf0] sm:$0xff]  ;;  %v4040_v35 = vld [vmem:[%s3884_s8 + $0xf8] sm:$0xff]  ;;  %v4047_v36 = vld [vmem:[%s3884_s8 + $0x100] sm:$0xff] }
  0x25   : > { %v4050_v37 = vld [vmem:[%s3884_s8 + $0x108] sm:$0xff]  ;;  %v4057_v38 = vld [vmem:[%s3884_s8 + $0x110] sm:$0xff]  ;;  %v4060_v39 = vld [vmem:[%s3884_s8 + $0x118] sm:$0xff] }
  0x26   : > { %v4067_v40 = vld [vmem:[%s3884_s8 + $0x120] sm:$0xff]  ;;  %v4070_v41 = vld [vmem:[%s3884_s8 + $0x128] sm:$0xff]  ;;  %v4077_v42 = vld [vmem:[%s3884_s8 + $0x130] sm:$0xff] }
  0x27   : > { %504 = vrot.lane.b32.xlu0 %v3917_v10, %s3775_s9  ;;  %506 = vrot.lane.b32.xlu1 %v3920_v11, %s3775_s9  ;;  %v4080_v43 = vld [vmem:[%s3884_s8 + $0x138] sm:$0xff]  ;;  %v4087_v44 = vld [vmem:[%s3884_s8 + $0x140] sm:$0xff] }
  0x28   : > { %v4090_v45 = vld [vmem:[%s3884_s8 + $0x148] sm:$0xff]  ;;  %v4097_v46 = vld [vmem:[%s3884_s8 + $0x150] sm:$0xff]  ;;  %v4100_v47 = vld [vmem:[%s3884_s8 + $0x158] sm:$0xff] }
  0x29   : > { %v4107_v48 = vld [vmem:[%s3884_s8 + $0x160] sm:$0xff]  ;;  %v4110_v49 = vld [vmem:[%s3884_s8 + $0x168] sm:$0xff]  ;;  %v4117_v50 = vld [vmem:[%s3884_s8 + $0x170] sm:$0xff] }
  0x2a   : > { %v4120_v51 = vld [vmem:[%s3884_s8 + $0x178] sm:$0xff]  ;;  %v4127_v52 = vld [vmem:[%s3884_s8 + $0x180] sm:$0xff]  ;;  %v4130_v53 = vld [vmem:[%s3884_s8 + $0x188] sm:$0xff] }
  0x2b   : > { %508 = vrot.lane.b32.xlu0 %v3927_v12, %s3775_s9  ;;  %510 = vrot.lane.b32.xlu1 %v3930_v13, %s3775_s9  ;;  %v4137_v54 = vld [vmem:[%s3884_s8 + $0x190] sm:$0xff]  ;;  %v4140_v55 = vld [vmem:[%s3884_s8 + $0x198] sm:$0xff] }
  0x2c   : > { %v4147_v56 = vld [vmem:[%s3884_s8 + $0x1a0] sm:$0xff]  ;;  %v4150_v57 = vld [vmem:[%s3884_s8 + $0x1a8] sm:$0xff]  ;;  %v4157_v58 = vld [vmem:[%s3884_s8 + $0x1b0] sm:$0xff] }
  0x2d   : > { %4985 = vst [vmem:[#allocation5_spill] sm:$0xff] %v4147_v56  ;;  %4986 = vst [vmem:[#allocation6_spill] sm:$0xff] %v4150_v57  ;;  %v4160_v59 = vld [vmem:[%s3884_s8 + $0x1b8] sm:$0xff]  ;;  %v4167_v60 = vld [vmem:[%s3884_s8 + $0x1c0] sm:$0xff] }
  0x2e   : > { %4987 = vst [vmem:[#allocation7_spill] sm:$0xff] %v4157_v58  ;;  %4988 = vst [vmem:[#allocation8_spill] sm:$0xff] %v4160_v59  ;;  %v4170_v61 = vld [vmem:[%s3884_s8 + $0x1c8] sm:$0xff]  ;;  %v4184_v0 = vld [vmem:[%s3884_s8 + $0x1d0] sm:$0xff] }
  0x2f   : > { %512 = vrot.lane.b32.xlu0 %v3937_v14, %s3775_s9  ;;  %514 = vrot.lane.b32.xlu1 %v3940_v15, %s3775_s9  ;;  %4989 = vst [vmem:[#allocation9_spill] sm:$0xff] %v4167_v60  ;;  %4990 = vst [vmem:[#allocation10_spill] sm:$0xff] %v4170_v61  ;;  %v4199_v5 = vld [vmem:[%s3884_s8 + $0x1e0] sm:$0xff] }
  0x33   : > { %516 = vrot.lane.b32.xlu0 %v3947_v16, %s3775_s9  ;;  %518 = vrot.lane.b32.xlu1 %v3950_v17, %s3775_s9 }
  0x37   : > { %520 = vrot.lane.b32.xlu0 %v3957_v18, %s3775_s9  ;;  %522 = vrot.lane.b32.xlu1 %v3960_v19, %s3775_s9 }
  0x3b   : > { %524 = vrot.lane.b32.xlu0 %v3967_v20, %s3775_s9  ;;  %526 = vrot.lane.b32.xlu1 %v3970_v21, %s3775_s9 }
  0x3f   : > { %528 = vrot.lane.b32.xlu0 %v3977_v22, %s3775_s9  ;;  %530 = vrot.lane.b32.xlu1 %v3980_v23, %s3775_s9 }
  0x43   : > { %532 = vrot.lane.b32.xlu0 %v3987_v24, %s3775_s9  ;;  %534 = vrot.lane.b32.xlu1 %v3990_v25, %s3775_s9 }
  0x47   : > { %536 = vrot.lane.b32.xlu0 %v3997_v26, %s3775_s9  ;;  %538 = vrot.lane.b32.xlu1 %v4000_v27, %s3775_s9 }
  0x4b   : > { %540 = vrot.lane.b32.xlu0 %v4007_v28, %s3775_s9  ;;  %542 = vrot.lane.b32.xlu1 %v4010_v29, %s3775_s9 }
  0x4f   : > { %544 = vrot.lane.b32.xlu0 %v4017_v30, %s3775_s9  ;;  %546 = vrot.lane.b32.xlu1 %v4020_v31, %s3775_s9 }
  0x53   : > { %548 = vrot.lane.b32.xlu0 %v4027_v32, %s3775_s9  ;;  %550 = vrot.lane.b32.xlu1 %v4030_v33, %s3775_s9 }
  0x57   : > { %552 = vrot.lane.b32.xlu0 %v4037_v34, %s3775_s9  ;;  %554 = vrot.lane.b32.xlu1 %v4040_v35, %s3775_s9 }
  0x5b   : > { %556 = vrot.lane.b32.xlu0 %v4047_v36, %s3775_s9  ;;  %558 = vrot.lane.b32.xlu1 %v4050_v37, %s3775_s9 }
  0x5f   : > { %560 = vrot.lane.b32.xlu0 %v4057_v38, %s3775_s9  ;;  %562 = vrot.lane.b32.xlu1 %v4060_v39, %s3775_s9 }
  0x63   : > { %564 = vrot.lane.b32.xlu0 %v4067_v40, %s3775_s9  ;;  %566 = vrot.lane.b32.xlu1 %v4070_v41, %s3775_s9 }
  0x67   : > { %568 = vrot.lane.b32.xlu0 %v4077_v42, %s3775_s9  ;;  %570 = vrot.lane.b32.xlu1 %v4080_v43, %s3775_s9 }
  0x6b   : > { %572 = vrot.lane.b32.xlu0 %v4087_v44, %s3775_s9  ;;  %574 = vrot.lane.b32.xlu1 %v4090_v45, %s3775_s9 }
  0x6f   : > { %576 = vrot.lane.b32.xlu0 %v4097_v46, %s3775_s9  ;;  %578 = vrot.lane.b32.xlu1 %v4100_v47, %s3775_s9 }
  0x73   : > { %580 = vrot.lane.b32.xlu0 %v4107_v48, %s3775_s9  ;;  %582 = vrot.lane.b32.xlu1 %v4110_v49, %s3775_s9 }
  0x77   : > { %584 = vrot.lane.b32.xlu0 %v4117_v50, %s3775_s9  ;;  %586 = vrot.lane.b32.xlu1 %v4120_v51, %s3775_s9 }
  0x7b   : > { %588 = vrot.lane.b32.xlu0 %v4127_v52, %s3775_s9  ;;  %590 = vrot.lane.b32.xlu1 %v4130_v53, %s3775_s9 }
  0x7f   : > { %592 = vrot.lane.b32.xlu0 %v4137_v54, %s3775_s9  ;;  %594 = vrot.lane.b32.xlu1 %v4140_v55, %s3775_s9 }
  0x83   : > { %596 = vrot.lane.b32.xlu0 %v4147_v56, %s3775_s9  ;;  %598 = vrot.lane.b32.xlu1 %v4150_v57, %s3775_s9  ;;  %v4203_v56 = vld [vmem:[%s3884_s8 + $0x1e8] sm:$0xff] }
  0x87   : > { %600 = vrot.lane.b32.xlu0 %v4157_v58, %s3775_s9  ;;  %602 = vrot.lane.b32.xlu1 %v4160_v59, %s3775_s9  ;;  %v4188_v59 = vld [vmem:[%s3884_s8 + $0x1d8] sm:$0xff] }
  0x88   : > { %4991 = vst [vmem:[#allocation11_spill] sm:$0xff] %v4188_v59 }
  0x8b   : > { %604 = vrot.lane.b32.xlu0 %v4167_v60, %s3775_s9  ;;  %606 = vrot.lane.b32.xlu1 %v4170_v61, %s3775_s9  ;;  %v367_v61 = vmax.f32 %v3900_v7, 0.0  ;;  %v369_v7 = vmax.f32 %v3910_v9, 0.0  ;;  %v371_v9 = vmax.f32 %v3920_v11, 0.0 }
  0x8d   : > { %v493_v2 = vpop.permute.xlu0 %492  ;;  %v497_v3 = vpop.permute.xlu1 %496 }
  0x8e   : > { %v685_v58 = vsel %vm684_vm0, %v364_v63, %v493_v2  ;;  %v687_v60 = vsel %vm684_vm0, %v366_v1, %v497_v3  ;;  %v4216_v1 = vld [vmem:[%s3884_s8 + $0x1f0] sm:$0xff] }
  0x8f   : > { %3350 = vmatprep.mubr.msk.f32.mxu0 %vm760_vm1, %v685_v58  ;;  %608 = vrot.lane.b32.xlu0 %v4184_v0, %s3775_s9  ;;  %v368_v58 = vmax.f32 %v3907_v8, 0.0 }
  0x90   : > { %610 = vrot.lane.b32.xlu1 %v4188_v59, %s3775_s9  ;;  %v4219_v59 = vld [vmem:[%s3884_s8 + $0x1f8] sm:$0xff]  ;;  %s3717_s8 = sshll.u32 %s3776_s28, 4  ;;  %s3718_s8 = int_to_ptr.vmem [resolvable:$false] %s3717_s8 }
  0x91   : > { %v495_v57 = vpop.permute.xlu0 %494  ;;  %v499_v6 = vpop.permute.xlu1 %498  ;;  %p3720_p0 = scmp.lt.s32.totalorder %s4917_s18, %s3718_s8 }
  0x92   : > { %v686_v63 = vsel %vm684_vm0, %v365_v4, %v495_v57  ;;  %v688_v2 = vsel %vm684_vm0, %v367_v61, %v499_v6  ;;  %v370_v57 = vmax.f32 %v3917_v10, 0.0  ;;  %v372_v10 = vmax.f32 %v3927_v12, 0.0 }
  0x93   : > { %3351 = vmatmul.mubr.msk.f32.vlgmr.msra.gmra.mxu0 %vm760_vm1, %v686_v63  ;;  %612 = vrot.lane.b32.xlu0 %v4199_v5, %s3775_s9  ;;  %v373_v63 = vmax.f32 %v3930_v13, 0.0  ;;  %v375_v12 = vmax.f32 %v3940_v15, 0.0 }
  0x94   : > { %3353 = vmatprep.mubr.msk.f32.mxu0 %vm760_vm1, %v687_v60  ;;  %614 = vrot.lane.b32.xlu1 %v4203_v56, %s3775_s9 }
  0x95   : > { %v501_v3 = vpop.permute.xlu0 %500  ;;  %v503_v8 = vpop.permute.xlu1 %502 }
  0x96   : > { %v689_v4 = vsel %vm684_vm0, %v368_v58, %v501_v3  ;;  %v690_v60 = vsel %vm684_vm0, %v369_v7, %v503_v8  ;;  %v374_v3 = vmax.f32 %v3937_v14, 0.0  ;;  %v377_v14 = vmax.f32 %v3950_v17, 0.0 }
  0x97   : > { %3354 = vmatmul.mubr.msk.f32.gmra.mxu0 %vm760_vm1, %v688_v2  ;;  %616 = vrot.lane.b32.xlu0 %v4216_v1, %s3775_s9 }
  0x98   : > { %3356 = vmatprep.mubr.msk.f32.mxu0 %vm760_vm1, %v689_v4  ;;  %618 = vrot.lane.b32.xlu1 %v4219_v59, %s3775_s9  ;;  %s3719_s9 = scalar_lea.vmem %s3718_s8, 2048 }
  0x99   : > { %v505_v61 = vpop.permute.xlu0 %504  ;;  %v507_v6 = vpop.permute.xlu1 %506  ;;  %p3721_p1 = scmp.lt.s32.totalorder %s3719_s9, %s3713_s29 }
  0x9a   : > { %v691_v58 = vsel %vm684_vm0, %v370_v57, %v505_v61  ;;  %v692_v2 = vsel %vm684_vm0, %v371_v9, %v507_v6  ;;  %v376_v9 = vmax.f32 %v3947_v16, 0.0  ;;  %v379_v16 = vmax.f32 %v3960_v19, 0.0 }
  0x9b   : > { %3357 = vmatmul.mubr.msk.f32.gmra.mxu0 %vm760_vm1, %v690_v60  ;;  %p3722_p2 = por %p3721_p1, %p3720_p0 }
  0x9c   : > { %3359 = vmatprep.mubr.msk.f32.mxu0 %vm760_vm1, %v691_v58 }
  0x9d   : > { %v509_v11 = vpop.permute.xlu0 %508  ;;  %v511_v7 = vpop.permute.xlu1 %510  ;;  %p3723_p3 = pnand %p3722_p2, %p3716_p13 }
  0x9e   : > { %v693_v8 = vsel %vm684_vm0, %v372_v10, %v509_v11  ;;  %v694_v57 = vsel %vm684_vm0, %v373_v63, %v511_v7  ;;  %v378_v10 = vmax.f32 %v3957_v18, 0.0  ;;  %v380_v11 = vmax.f32 %v3967_v20, 0.0 }
  0x9f   : > { %3360 = vmatmul.mubr.msk.f32.gmra.mxu0 %vm760_vm1, %v692_v2  ;;  %v381_v18 = vmax.f32 %v3970_v21, 0.0  ;;  %v383_v20 = vmax.f32 %v3980_v23, 0.0 }
  0xa0   : > { %3362 = vmatprep.mubr.msk.f32.mxu0 %vm760_vm1, %v693_v8 }
  0xa1   : > { %v513_v4 = vpop.permute.xlu0 %512  ;;  %v515_v13 = vpop.permute.xlu1 %514 }
  0xa2   : > { %v695_v60 = vsel %vm684_vm0, %v374_v3, %v513_v4  ;;  %v696_v61 = vsel %vm684_vm0, %v375_v12, %v515_v13  ;;  %v382_v12 = vmax.f32 %v3977_v22, 0.0  ;;  %v385_v22 = vmax.f32 %v3990_v25, 0.0 }
  0xa3   : > { %3363 = vmatmul.mubr.msk.f32.gmra.mxu0 %vm760_vm1, %v694_v57 }
  0xa4   : > { %3365 = vmatprep.mubr.msk.f32.mxu0 %vm760_vm1, %v695_v60 }
  0xa5   : > { %v517_v6 = vpop.permute.xlu0 %516  ;;  %v519_v15 = vpop.permute.xlu1 %518 }
  0xa6   : > { %v697_v58 = vsel %vm684_vm0, %v376_v9, %v517_v6  ;;  %v698_v63 = vsel %vm684_vm0, %v377_v14, %v519_v15  ;;  %v384_v9 = vmax.f32 %v3987_v24, 0.0  ;;  %v386_v6 = vmax.f32 %v3997_v26, 0.0 }
  0xa7   : > { %3366 = vmatmul.mubr.msk.f32.gmra.mxu0 %vm760_vm1, %v696_v61  ;;  %v387_v24 = vmax.f32 %v4000_v27, 0.0  ;;  %v389_v26 = vmax.f32 %v4010_v29, 0.0 }
  0xa8   : > { %3368 = vmatprep.mubr.msk.f32.mxu0 %vm760_vm1, %v697_v58 }
  0xa9   : > { %v521_v2 = vpop.permute.xlu0 %520  ;;  %v523_v17 = vpop.permute.xlu1 %522 }
  0xaa   : > { %v699_v7 = vsel %vm684_vm0, %v378_v10, %v521_v2  ;;  %v700_v3 = vsel %vm684_vm0, %v379_v16, %v523_v17  ;;  %v388_v16 = vmax.f32 %v4007_v28, 0.0  ;;  %v391_v28 = vmax.f32 %v4020_v31, 0.0 }
  0xab   : > { %3369 = vmatmul.mubr.msk.f32.gmra.mxu0 %vm760_vm1, %v698_v63 }
  0xac   : > { %3371 = vmatprep.mubr.msk.f32.mxu0 %vm760_vm1, %v699_v7 }
  0xad   : > { %v525_v8 = vpop.permute.xlu0 %524  ;;  %v527_v19 = vpop.permute.xlu1 %526 }
  0xae   : > { %v701_v57 = vsel %vm684_vm0, %v380_v11, %v525_v8  ;;  %v702_v4 = vsel %vm684_vm0, %v381_v18, %v527_v19  ;;  %v390_v11 = vmax.f32 %v4017_v30, 0.0  ;;  %v392_v8 = vmax.f32 %v4027_v32, 0.0 }
  0xaf   : > { %3372 = vmatmul.mubr.msk.f32.gmra.mxu0 %vm760_vm1, %v700_v3  ;;  %v393_v30 = vmax.f32 %v4030_v33, 0.0  ;;  %v395_v32 = vmax.f32 %v4040_v35, 0.0 }
  0xb0   : > { %3374 = vmatprep.mubr.msk.f32.mxu0 %vm760_vm1, %v701_v57 }
  0xb1   : > { %v529_v13 = vpop.permute.xlu0 %528  ;;  %v531_v21 = vpop.permute.xlu1 %530 }
  0xb2   : > { %v703_v60 = vsel %vm684_vm0, %v382_v12, %v529_v13  ;;  %v704_v14 = vsel %vm684_vm0, %v383_v20, %v531_v21  ;;  %v394_v20 = vmax.f32 %v4037_v34, 0.0 }
  0xb3   : > { %3375 = vmatmul.mubr.msk.f32.gmra.mxu0 %vm760_vm1, %v702_v4 }
  0xb4   : > { %3377 = vmatprep.mubr.msk.f32.mxu0 %vm760_vm1, %v703_v60  ;;  %v397_v60 = vmax.f32 %v4050_v37, 0.0  ;;  %v1475_v37 = vld [vmem:[%s4971_s3 + $0x30] sm:$0xff] }
  0xb5   : > { %v533_v61 = vpop.permute.xlu0 %532  ;;  %v535_v23 = vpop.permute.xlu1 %534 }
  0xb6   : > { %v705_v15 = vsel %vm684_vm0, %v384_v9, %v533_v61  ;;  %v706_v10 = vsel %vm684_vm0, %v385_v22, %v535_v23  ;;  %v396_v9 = vmax.f32 %v4047_v36, 0.0  ;;  %v398_v61 = vmax.f32 %v4057_v38, 0.0  ;;  %v1474_v38 = vld [vmem:[%s4971_s3 + $0x28] sm:$0xff] }
  0xb7   : > { %3378 = vmatmul.mubr.msk.f32.gmra.mxu0 %vm760_vm1, %v704_v14  ;;  %v399_v23 = vmax.f32 %v4060_v39, 0.0  ;;  %v400_v39 = vmax.f32 %v4067_v40, 0.0  ;;  %v1472_v40 = vld [vmem:[%s4971_s3 + $0x18] sm:$0xff] }
  0xb8   : > { %3380 = vmatprep.mubr.msk.f32.mxu0 %vm760_vm1, %v705_v15 }
  0xb9   : > { %v537_v58 = vpop.permute.xlu0 %536  ;;  %v539_v25 = vpop.permute.xlu1 %538 }
  0xba   : > { %v707_v63 = vsel %vm684_vm0, %v386_v6, %v537_v58  ;;  %v708_v2 = vsel %vm684_vm0, %v387_v24, %v539_v25 }
  0xbb   : > { %3381 = vmatmul.mubr.msk.f32.gmra.mxu0 %vm760_vm1, %v706_v10  ;;  %v401_v10 = vmax.f32 %v4070_v41, 0.0  ;;  %v402_v41 = vmax.f32 %v4077_v42, 0.0  ;;  %v1470_v42 = vld [vmem:[%s4971_s3 + $0x8] sm:$0xff] }
  0xbc   : > { %3383 = vmatprep.mubr.msk.f32.mxu0 %vm760_vm1, %v707_v63 }
  0xbd   : > { %v541_v17 = vpop.permute.xlu0 %540  ;;  %v543_v27 = vpop.permute.xlu1 %542 }
  0xbe   : > { %v709_v7 = vsel %vm684_vm0, %v388_v16, %v541_v17  ;;  %v710_v18 = vsel %vm684_vm0, %v389_v26, %v543_v27  ;;  %v403_v26 = vmax.f32 %v4080_v43, 0.0  ;;  %v1471_v27 = vld [vmem:[%s4971_s3 + $0x10] sm:$0xff]  ;;  %v404_v43 = vmax.f32 %v4087_v44, 0.0 }
  0xbf   : > { %3384 = vmatmul.mubr.msk.f32.gmra.mxu0 %vm760_vm1, %v708_v2  ;;  %v406_v44 = vmax.f32 %v4097_v46, 0.0 }
  0xc0   : > { %3386 = vmatprep.mubr.msk.f32.mxu0 %vm760_vm1, %v709_v7 }
  0xc1   : > { %v545_v3 = vpop.permute.xlu0 %544  ;;  %v547_v29 = vpop.permute.xlu1 %546 }
  0xc2   : > { %v711_v19 = vsel %vm684_vm0, %v390_v11, %v545_v3  ;;  %v712_v12 = vsel %vm684_vm0, %v391_v28, %v547_v29  ;;  %v405_v28 = vmax.f32 %v4090_v45, 0.0  ;;  %v1469_v29 = vld [vmem:[%s4971_s3] sm:$0xff]  ;;  %v407_v45 = vmax.f32 %v4100_v47, 0.0 }
  0xc3   : > { %3387 = vmatmul.mubr.msk.f32.gmra.mxu0 %vm760_vm1, %v710_v18 }
  0xc4   : > { %3389 = vmatprep.mubr.msk.f32.mxu0 %vm760_vm1, %v711_v19 }
  0xc5   : > { %v549_v57 = vpop.permute.xlu0 %548  ;;  %v551_v31 = vpop.permute.xlu1 %550 }
  0xc6   : > { %v713_v4 = vsel %vm684_vm0, %v392_v8, %v549_v57  ;;  %v714_v13 = vsel %vm684_vm0, %v393_v30, %v551_v31 }
  0xc7   : > { %3390 = vmatmul.mubr.msk.f32.gmra.mxu0 %vm760_vm1, %v712_v12 }
  0xc8   : > { %3392 = vmatprep.mubr.msk.f32.mxu0 %vm760_vm1, %v713_v4  ;;  %v409_v4 = vmax.f32 %v4110_v49, 0.0 }
  0xc9   : > { %v553_v21 = vpop.permute.xlu0 %552  ;;  %v555_v33 = vpop.permute.xlu1 %554 }
  0xca   : > { %v715_v22 = vsel %vm684_vm0, %v394_v20, %v553_v21  ;;  %v716_v34 = vsel %vm684_vm0, %v395_v32, %v555_v33  ;;  %v408_v20 = vmax.f32 %v4107_v48, 0.0  ;;  %v410_v21 = vmax.f32 %v4117_v50, 0.0 }
  0xcb   : > { %3393 = vmatmul.mubr.msk.f32.gmra.mxu0 %vm760_vm1, %v714_v13  ;;  %v411_v33 = vmax.f32 %v4120_v51, 0.0 }
  0xcc   : > { %3395 = vmatprep.mubr.msk.f32.mxu0 %vm760_vm1, %v715_v22  ;;  %v412_v22 = vmax.f32 %v4127_v52, 0.0 }
  0xcd   : > { %v557_v14 = vpop.permute.xlu0 %556  ;;  %v559_v35 = vpop.permute.xlu1 %558 }
  0xce   : > { %v718_v6 = vsel %vm684_vm0, %v397_v60, %v559_v35  ;;  %v717_v36 = vsel %vm684_vm0, %v396_v9, %v557_v14 }
  0xcf   : > { %3396 = vmatmul.mubr.msk.f32.gmra.mxu0 %vm760_vm1, %v716_v34  ;;  %3398 = vmatprep.mubr.msk.f32.mxu1 %vm760_vm1, %v717_v36  ;;  %v413_v34 = vmax.f32 %v4130_v53, 0.0 }
  0xd0   : > { %3399 = vmatmul.mubr.msk.f32.vlgmr.msra.gmra.mxu1 %vm760_vm1, %v718_v6 }
  0xd1   : > { %v561_v15 = vpop.permute.xlu0 %560  ;;  %v563_v24 = vpop.permute.xlu1 %562  ;;  %3447 = vmatpush3.msra.mxu1 %v4175_v62  ;;  %v1473_v62 = vld [vmem:[%s4971_s3 + $0x20] sm:$0xff] }
  0xd2   : > { %v719_v58 = vsel %vm684_vm0, %v398_v61, %v561_v15  ;;  %v720_v25 = vsel %vm684_vm0, %v399_v23, %v563_v24  ;;  %3448 = vmatprep.subr.mxu1 %v1475_v37  ;;  %v414_v61 = vmax.f32 %v4137_v54, 0.0  ;;  %v415_v23 = vmax.f32 %v4140_v55, 0.0  ;;  %v4993_v24 = vld [vmem:[#allocation6_spill] sm:$0xff] }
  0xd3   : > { %3401 = vmatprep.mubr.msk.f32.mxu1 %vm760_vm1, %v719_v58  ;;  %3449 = vmatpush3.msra.mxu1 %v1475_v37  ;;  %v4992_v37 = vld [vmem:[#allocation5_spill] sm:$0xff]  ;;  %v4994_v58 = vld [vmem:[#allocation7_spill] sm:$0xff] }
  0xd4   : > { %3402 = vmatmul.mubr.msk.f32.gmra.mxu1 %vm760_vm1, %v720_v25  ;;  %3450 = vmatprep.subr.mxu1 %v1474_v38  ;;  %v416_v15 = vmax.f32 %v4992_v37, 0.0  ;;  %v418_v25 = vmax.f32 %v4994_v58, 0.0 }
  0xd5   : > { %v565_v16 = vpop.permute.xlu0 %564  ;;  %v567_v63 = vpop.permute.xlu1 %566  ;;  %3451 = vmatpush3.msra.mxu1 %v1474_v38  ;;  %v417_v38 = vmax.f32 %v4993_v24, 0.0 }
  0xd6   : > { %v721_v2 = vsel %vm684_vm0, %v400_v39, %v565_v16  ;;  %v722_v17 = vsel %vm684_vm0, %v401_v10, %v567_v63  ;;  %3452 = vmatprep.subr.mxu1 %v1473_v62 }
  0xd7   : > { %3404 = vmatprep.mubr.msk.f32.mxu1 %vm760_vm1, %v721_v2  ;;  %3453 = vmatpush3.msra.mxu1 %v1473_v62  ;;  %v4995_v62 = vld [vmem:[#allocation8_spill] sm:$0xff]  ;;  %v4996_v2 = vld [vmem:[#allocation9_spill] sm:$0xff] }
  0xd8   : > { %3405 = vmatmul.mubr.msk.f32.gmra.mxu1 %vm760_vm1, %v722_v17  ;;  %3454 = vmatprep.subr.mxu1 %v1472_v40  ;;  %v419_v16 = vmax.f32 %v4995_v62, 0.0  ;;  %v420_v17 = vmax.f32 %v4996_v2, 0.0 }
  0xd9   : > { %v569_v11 = vpop.permute.xlu0 %568  ;;  %v571_v7 = vpop.permute.xlu1 %570  ;;  %3455 = vmatpush3.msra.mxu1 %v1472_v40 }
  0xda   : > { %v723_v18 = vsel %vm684_vm0, %v402_v41, %v569_v11  ;;  %v724_v3 = vsel %vm684_vm0, %v403_v26, %v571_v7  ;;  %3456 = vmatprep.subr.mxu1 %v1471_v27 }
  0xdb   : > { %3407 = vmatprep.mubr.msk.f32.mxu1 %vm760_vm1, %v723_v18  ;;  %3457 = vmatpush3.msra.mxu1 %v1471_v27  ;;  %v4997_v27 = vld [vmem:[#allocation10_spill] sm:$0xff]  ;;  %v422_v18 = vmax.f32 %v4184_v0, 0.0 }
  0xdc   : > { %3408 = vmatmul.mubr.msk.f32.gmra.mxu1 %vm760_vm1, %v724_v3  ;;  %3458 = vmatprep.subr.mxu1 %v1470_v42  ;;  %v421_v11 = vmax.f32 %v4997_v27, 0.0 }
  0xdd   : > { %v573_v8 = vpop.permute.xlu0 %572  ;;  %v575_v19 = vpop.permute.xlu1 %574  ;;  %3459 = vmatpush3.msra.mxu1 %v1470_v42 }
  0xde   : > { %v725_v30 = vsel %vm684_vm0, %v404_v43, %v573_v8  ;;  %v726_v12 = vsel %vm684_vm0, %v405_v28, %v575_v19  ;;  %3460 = vmatprep.subr.mxu1 %v1469_v29  ;;  %v4998_v8 = vld [vmem:[#allocation11_spill] sm:$0xff] }
  0xdf   : > { %3410 = vmatprep.mubr.msk.f32.mxu1 %vm760_vm1, %v725_v30  ;;  %3461 = vmatpush3.msra.mxu1 %v1469_v29  ;;  %v423_v19 = vmax.f32 %v4998_v8, 0.0 }
  0xe0   : > { %3411 = vmatmul.mubr.msk.f32.gmra.mxu1 %vm760_vm1, %v726_v12 }
  0xe1   : > { %v577_v57 = vpop.permute.xlu0 %576  ;;  %v579_v31 = vpop.permute.xlu1 %578 }
  0xe2   : > { %v727_v46 = vsel %vm684_vm0, %v406_v44, %v577_v57  ;;  %v728_v47 = vsel %vm684_vm0, %v407_v45, %v579_v31  ;;  %v424_v45 = vmax.f32 %v4199_v5, 0.0  ;;  %v425_v57 = vmax.f32 %v4203_v56, 0.0 }
  0xe3   : > { %3413 = vmatprep.mubr.msk.f32.mxu1 %vm760_vm1, %v727_v46 }
  0xe4   : > { %3414 = vmatmul.mubr.msk.f32.gmra.mxu1 %vm760_vm1, %v728_v47  ;;  %v427_v47 = vmax.f32 %v4219_v59, 0.0  ;;  %v4429_v59 = vld [vmem:[%s4970_s2] ss:$0 sm:$0xff] }
  0xe5   : > { %v581_v32 = vpop.permute.xlu0 %580  ;;  %v583_v13 = vpop.permute.xlu1 %582 }
  0xe6   : > { %v729_v9 = vsel %vm684_vm0, %v408_v20, %v581_v32  ;;  %v730_v48 = vsel %vm684_vm0, %v409_v4, %v583_v13  ;;  %v426_v20 = vmax.f32 %v4216_v1, 0.0  ;;  %v1338_v1 = vlaneseq }
  0xe7   : > { %3416 = vmatprep.mubr.msk.f32.mxu1 %vm760_vm1, %v729_v9 }
  0xe8   : > { %3417 = vmatmul.mubr.msk.f32.gmra.mxu1 %vm760_vm1, %v730_v48  ;;  %v4432_v48 = vand.u32 127, %v1338_v1 }
  0xe9   : > { %v585_v49 = vpop.permute.xlu0 %584  ;;  %v587_v60 = vpop.permute.xlu1 %586 }
  0xea   : > { %v731_v14 = vsel %vm684_vm0, %v410_v21, %v585_v49  ;;  %v732_v50 = vsel %vm684_vm0, %v411_v33, %v587_v60  ;;  %v2129_v49 = vld [vmem:[%s4973_s5 + $0x18] sm:$0xff]  ;;  %vm1340_vm2 = vcmp.lt.s32.totalorder %v4432_v48, 32 }
  0xeb   : > { %3419 = vmatprep.mubr.msk.f32.mxu1 %vm760_vm1, %v731_v14  ;;  %3558 = vmatprep.subr.mxu0 %v2129_v49 }
  0xec   : > { %3420 = vmatmul.mubr.msk.f32.gmra.mxu1 %vm760_vm1, %v732_v50  ;;  %3559 = vmatpush3.msra.mxu0 %v2129_v49 }
  0xed   : > { %v589_v51 = vpop.permute.xlu0 %588  ;;  %v591_v35 = vpop.permute.xlu1 %590 }
  0xee   : > { %v733_v6 = vsel %vm684_vm0, %v412_v22, %v589_v51  ;;  %v734_v52 = vsel %vm684_vm0, %v413_v34, %v591_v35  ;;  %v2128_v35 = vld [vmem:[%s4973_s5 + $0x10] sm:$0xff] }
  0xef   : > { %3422 = vmatprep.mubr.msk.f32.mxu1 %vm760_vm1, %v733_v6  ;;  %3560 = vmatprep.subr.mxu0 %v2128_v35 }
  0xf0   : > { %3423 = vmatmul.mubr.msk.f32.gmra.mxu1 %vm760_vm1, %v734_v52  ;;  %3561 = vmatpush3.msra.mxu0 %v2128_v35 }
  0xf1   : > { %v593_v53 = vpop.permute.xlu0 %592  ;;  %v595_v36 = vpop.permute.xlu1 %594 }
  0xf2   : > { %v735_v39 = vsel %vm684_vm0, %v414_v61, %v593_v53  ;;  %v736_v54 = vsel %vm684_vm0, %v415_v23, %v595_v36  ;;  %v2127_v61 = vld [vmem:[%s4973_s5 + $0x8] sm:$0xff]  ;;  %v2126_v53 = vld [vmem:[%s4973_s5] sm:$0xff] }
  0xf3   : > { %3425 = vmatprep.mubr.msk.f32.mxu1 %vm760_vm1, %v735_v39  ;;  %3562 = vmatprep.subr.mxu0 %v2127_v61 }
  0xf4   : > { %3426 = vmatmul.mubr.msk.f32.gmra.mxu1 %vm760_vm1, %v736_v54  ;;  %3563 = vmatpush3.msra.mxu0 %v2127_v61 }
  0xf5   : > { %v597_v55 = vpop.permute.xlu0 %596  ;;  %v599_v10 = vpop.permute.xlu1 %598  ;;  %3564 = vmatprep.subr.mxu0 %v2126_v53 }
  0xf6   : > { %v737_v63 = vsel %vm684_vm0, %v416_v15, %v597_v55  ;;  %v738_v40 = vsel %vm684_vm0, %v417_v38, %v599_v10  ;;  %3565 = vmatpush3.msra.mxu0 %v2126_v53 }
  0xf7   : > { %3428 = vmatprep.mubr.msk.f32.mxu1 %vm760_vm1, %v737_v63 }
  0xf8   : > { %3429 = vmatmul.mubr.msk.f32.gmra.mxu1 %vm760_vm1, %v738_v40 }
  0xf9   : > { %v601_v41 = vpop.permute.xlu0 %600  ;;  %v603_v26 = vpop.permute.xlu1 %602 }
  0xfa   : > { %v739_v7 = vsel %vm684_vm0, %v418_v25, %v601_v41  ;;  %v740_v42 = vsel %vm684_vm0, %v419_v16, %v603_v26 }
  0xfb   : > { %3431 = vmatprep.mubr.msk.f32.mxu1 %vm760_vm1, %v739_v7 }
  0xfc   : > { %3432 = vmatmul.mubr.msk.f32.gmra.mxu1 %vm760_vm1, %v740_v42 }
  0xfd   : > { %v605_v43 = vpop.permute.xlu0 %604  ;;  %v607_v28 = vpop.permute.xlu1 %606 }
  0xfe   : > { %v741_v3 = vsel %vm684_vm0, %v420_v17, %v605_v43  ;;  %v742_v29 = vsel %vm684_vm0, %v421_v11, %v607_v28 }
  0xff   : > { %3434 = vmatprep.mubr.msk.f32.mxu1 %vm760_vm1, %v741_v3 }
 0x100   : > { %3435 = vmatmul.mubr.msk.f32.gmra.mxu1 %vm760_vm1, %v742_v29 }
 0x101   : > { %v609_v44 = vpop.permute.xlu0 %608 }
 0x102   : > { %v743_v30 = vsel %vm684_vm0, %v422_v18, %v609_v44  ;;  %v611_v12 = vpop.permute.xlu1 %610 }
 0x103   : > { %v744_v0 = vsel %vm684_vm0, %v423_v19, %v611_v12  ;;  %3437 = vmatprep.mubr.msk.f32.mxu1 %vm760_vm1, %v743_v30 }
 0x104   : > { %3438 = vmatmul.mubr.msk.f32.gmra.mxu1 %vm760_vm1, %v744_v0 }
 0x105   : > { %v613_v31 = vpop.permute.xlu0 %612 }
 0x106   : > { %v745_v4 = vsel %vm684_vm0, %v424_v45, %v613_v31  ;;  %v615_v46 = vpop.permute.xlu1 %614 }
 0x107   : > { %v746_v5 = vsel %vm684_vm0, %v425_v57, %v615_v46  ;;  %3440 = vmatprep.mubr.msk.f32.mxu1 %vm760_vm1, %v745_v4 }
 0x108   : > { %3441 = vmatmul.mubr.msk.f32.gmra.mxu1 %vm760_vm1, %v746_v5 }
 0x109   : > { %v617_v56 = vpop.permute.xlu0 %616 }
 0x10a   : > { %v747_v32 = vsel %vm684_vm0, %v426_v20, %v617_v56  ;;  %v619_v13 = vpop.permute.xlu1 %618 }
 0x10b   : > { %v748_v21 = vsel %vm684_vm0, %v427_v47, %v619_v13  ;;  %3443 = vmatprep.mubr.msk.f32.mxu1 %vm760_vm1, %v747_v32 }
 0x10c   : > { %3444 = vmatmul.mubr.msk.f32.gmra.mxu1 %vm760_vm1, %v748_v21 }
 0x153   : > { %v3352_v33 = vpop.f32.mrf.mxu0 }
 0x154   : > { %v1025_v9 = vadd.f32 %v3352_v33, %v4429_v59 }
 0x155   : > { %v1019_v60 = vpop.f32.mrf.mxu0 }
 0x156   : > { %v1020_v22 = vadd.f32 %v4429_v59, %v1019_v60  ;;  %v1342_v34 = vmax.f32 %v1025_v9, 0.0 }
 0x157   : > { %v3355_v14 = vpop.f32.mrf.mxu0 }
 0x158   : > { %v1341_v50 = vmax.f32 %v1020_v22, 0.0  ;;  %v1035_v51 = vadd.f32 %v3355_v14, %v4429_v59  ;;  %v1406_v36 = vsel %vm1340_vm2, %v1342_v34, %v1025_v9 }
 0x159   : > { %v1029_v23 = vpop.f32.mrf.mxu0 }
 0x15a   : > { %v1030_v6 = vadd.f32 %v4429_v59, %v1029_v23  ;;  %v1405_v52 = vsel %vm1340_vm2, %v1341_v50, %v1020_v22  ;;  %v1344_v37 = vmax.f32 %v1035_v51, 0.0 }
 0x15b   : > { %v3358_v15 = vpop.f32.mrf.mxu0  ;;  %3462 = vmatprep.mubr.msk.f32.mxu1 %vm1484_vm3, %v1405_v52 }
 0x15c   : > { %v1343_v24 = vmax.f32 %v1030_v6, 0.0  ;;  %v1045_v38 = vadd.f32 %v3358_v15, %v4429_v59  ;;  %3463 = vmatmul.mubr.msk.f32.vlgmr.msra.gmra.mxu1 %vm1484_vm3, %v1406_v36  ;;  %v1408_v25 = vsel %vm1340_vm2, %v1344_v37, %v1035_v51 }
 0x15d   : > { %v1039_v39 = vpop.f32.mrf.mxu0 }
 0x15e   : > { %v1040_v54 = vadd.f32 %v4429_v59, %v1039_v39  ;;  %v1407_v55 = vsel %vm1340_vm2, %v1343_v24, %v1030_v6  ;;  %v1346_v10 = vmax.f32 %v1045_v38, 0.0 }
 0x15f   : > { %v3361_v58 = vpop.f32.mrf.mxu0  ;;  %3465 = vmatprep.mubr.msk.f32.mxu1 %vm1484_vm3, %v1407_v55 }
 0x160   : > { %v1345_v62 = vmax.f32 %v1040_v54, 0.0  ;;  %v1055_v16 = vadd.f32 %v3361_v58, %v4429_v59  ;;  %3466 = vmatmul.mubr.msk.f32.gmra.mxu1 %vm1484_vm3, %v1408_v25  ;;  %v1410_v17 = vsel %vm1340_vm2, %v1346_v10, %v1045_v38 }
 0x161   : > { %v1049_v63 = vpop.f32.mrf.mxu0 }
 0x162   : > { %v1050_v40 = vadd.f32 %v4429_v59, %v1049_v63  ;;  %v1409_v41 = vsel %vm1340_vm2, %v1345_v62, %v1040_v54  ;;  %v1348_v26 = vmax.f32 %v1055_v16, 0.0 }
 0x163   : > { %v3364_v2 = vpop.f32.mrf.mxu0  ;;  %3468 = vmatprep.mubr.msk.f32.mxu1 %vm1484_vm3, %v1409_v41 }
 0x164   : > { %v1347_v27 = vmax.f32 %v1050_v40, 0.0  ;;  %v1065_v11 = vadd.f32 %v3364_v2, %v4429_v59  ;;  %3469 = vmatmul.mubr.msk.f32.gmra.mxu1 %vm1484_vm3, %v1410_v17  ;;  %v1412_v3 = vsel %vm1340_vm2, %v1348_v26, %v1055_v16 }
 0x165   : > { %v1059_v7 = vpop.f32.mrf.mxu0 }
 0x166   : > { %v1060_v42 = vadd.f32 %v4429_v59, %v1059_v7  ;;  %v1411_v43 = vsel %vm1340_vm2, %v1347_v27, %v1050_v40  ;;  %v1350_v28 = vmax.f32 %v1065_v11, 0.0 }
 0x167   : > { %v3367_v18 = vpop.f32.mrf.mxu0  ;;  %3471 = vmatprep.mubr.msk.f32.mxu1 %vm1484_vm3, %v1411_v43 }
 0x168   : > { %v1349_v29 = vmax.f32 %v1060_v42, 0.0  ;;  %v1075_v8 = vadd.f32 %v3367_v18, %v4429_v59  ;;  %3472 = vmatmul.mubr.msk.f32.gmra.mxu1 %vm1484_vm3, %v1412_v3  ;;  %v1414_v57 = vsel %vm1340_vm2, %v1350_v28, %v1065_v11 }
 0x169   : > { %v1069_v19 = vpop.f32.mrf.mxu0 }
 0x16a   : > { %v1070_v44 = vadd.f32 %v4429_v59, %v1069_v19  ;;  %v1413_v45 = vsel %vm1340_vm2, %v1349_v29, %v1060_v42  ;;  %v1352_v30 = vmax.f32 %v1075_v8, 0.0 }
 0x16b   : > { %v3370_v12 = vpop.f32.mrf.mxu0  ;;  %3474 = vmatprep.mubr.msk.f32.mxu1 %vm1484_vm3, %v1413_v45 }
 0x16c   : > { %v1351_v0 = vmax.f32 %v1070_v44, 0.0  ;;  %v1085_v31 = vadd.f32 %v3370_v12, %v4429_v59  ;;  %3475 = vmatmul.mubr.msk.f32.gmra.mxu1 %vm1484_vm3, %v1414_v57  ;;  %v1416_v56 = vsel %vm1340_vm2, %v1352_v30, %v1075_v8 }
 0x16d   : > { %v1079_v20 = vpop.f32.mrf.mxu0 }
 0x16e   : > { %v1080_v4 = vadd.f32 %v4429_v59, %v1079_v20  ;;  %v1415_v46 = vsel %vm1340_vm2, %v1351_v0, %v1070_v44  ;;  %v1354_v47 = vmax.f32 %v1085_v31, 0.0 }
 0x16f   : > { %v3373_v5 = vpop.f32.mrf.mxu0  ;;  %3477 = vmatprep.mubr.msk.f32.mxu1 %vm1484_vm3, %v1415_v46 }
 0x170   : > { %v1353_v32 = vmax.f32 %v1080_v4, 0.0  ;;  %v1095_v13 = vadd.f32 %v3373_v5, %v4429_v59  ;;  %3478 = vmatmul.mubr.msk.f32.gmra.mxu1 %vm1484_vm3, %v1416_v56  ;;  %v1418_v60 = vsel %vm1340_vm2, %v1354_v47, %v1085_v31 }
 0x171   : > { %v1089_v21 = vpop.f32.mrf.mxu0 }
 0x172   : > { %v1090_v1 = vadd.f32 %v4429_v59, %v1089_v21  ;;  %v1417_v33 = vsel %vm1340_vm2, %v1353_v32, %v1080_v4  ;;  %v1356_v9 = vmax.f32 %v1095_v13, 0.0 }
 0x173   : > { %v3376_v49 = vpop.f32.mrf.mxu0  ;;  %3480 = vmatprep.mubr.msk.f32.mxu1 %vm1484_vm3, %v1417_v33 }
 0x174   : > { %v1355_v22 = vmax.f32 %v1090_v1, 0.0  ;;  %v1105_v34 = vadd.f32 %v3376_v49, %v4429_v59  ;;  %3481 = vmatmul.mubr.msk.f32.gmra.mxu1 %vm1484_vm3, %v1418_v60  ;;  %v1420_v23 = vsel %vm1340_vm2, %v1356_v9, %v1095_v13 }
 0x175   : > { %v1099_v14 = vpop.f32.mrf.mxu0 }
 0x176   : > { %v1100_v50 = vadd.f32 %v4429_v59, %v1099_v14  ;;  %v1419_v51 = vsel %vm1340_vm2, %v1355_v22, %v1090_v1  ;;  %v1358_v35 = vmax.f32 %v1105_v34, 0.0 }
 0x177   : > { %v3379_v61 = vpop.f32.mrf.mxu0  ;;  %3483 = vmatprep.mubr.msk.f32.mxu1 %vm1484_vm3, %v1419_v51 }
 0x178   : > { %v1357_v6 = vmax.f32 %v1100_v50, 0.0  ;;  %v1115_v52 = vadd.f32 %v3379_v61, %v4429_v59  ;;  %3484 = vmatmul.mubr.msk.f32.gmra.mxu1 %vm1484_vm3, %v1420_v23  ;;  %v1422_v38 = vsel %vm1340_vm2, %v1358_v35, %v1105_v34 }
 0x179   : > { %v1109_v53 = vpop.f32.mrf.mxu0 }
 0x17a   : > { %v1110_v36 = vadd.f32 %v4429_v59, %v1109_v53  ;;  %v1421_v37 = vsel %vm1340_vm2, %v1357_v6, %v1100_v50  ;;  %v1360_v15 = vmax.f32 %v1115_v52, 0.0 }
 0x17b   : > { %v3382_v24 = vpop.f32.mrf.mxu0  ;;  %3486 = vmatprep.mubr.msk.f32.mxu1 %vm1484_vm3, %v1421_v37 }
 0x17c   : > { %v1359_v39 = vmax.f32 %v1110_v36, 0.0  ;;  %v1125_v54 = vadd.f32 %v3382_v24, %v4429_v59  ;;  %3487 = vmatmul.mubr.msk.f32.gmra.mxu1 %vm1484_vm3, %v1422_v38  ;;  %v1424_v16 = vsel %vm1340_vm2, %v1360_v15, %v1115_v52 }
 0x17d   : > { %v1119_v55 = vpop.f32.mrf.mxu0 }
 0x17e   : > { %v1120_v10 = vadd.f32 %v4429_v59, %v1119_v55  ;;  %v1423_v58 = vsel %vm1340_vm2, %v1359_v39, %v1110_v36  ;;  %v1362_v25 = vmax.f32 %v1125_v54, 0.0 }
 0x17f   : > { %v3385_v62 = vpop.f32.mrf.mxu0  ;;  %3489 = vmatprep.mubr.msk.f32.mxu1 %vm1484_vm3, %v1423_v58 }
 0x180   : > { %v1361_v63 = vmax.f32 %v1120_v10, 0.0  ;;  %v1135_v40 = vadd.f32 %v3385_v62, %v4429_v59  ;;  %3490 = vmatmul.mubr.msk.f32.gmra.mxu1 %vm1484_vm3, %v1424_v16  ;;  %v1426_v11 = vsel %vm1340_vm2, %v1362_v25, %v1125_v54 }
 0x181   : > { %v1129_v41 = vpop.f32.mrf.mxu0 }
 0x182   : > { %v1130_v26 = vadd.f32 %v4429_v59, %v1129_v41  ;;  %v1425_v2 = vsel %vm1340_vm2, %v1361_v63, %v1120_v10  ;;  %v1364_v17 = vmax.f32 %v1135_v40, 0.0 }
 0x183   : > { %v3388_v27 = vpop.f32.mrf.mxu0  ;;  %3492 = vmatprep.mubr.msk.f32.mxu1 %vm1484_vm3, %v1425_v2 }
 0x184   : > { %v1363_v7 = vmax.f32 %v1130_v26, 0.0  ;;  %v1145_v42 = vadd.f32 %v3388_v27, %v4429_v59  ;;  %3493 = vmatmul.mubr.msk.f32.gmra.mxu1 %vm1484_vm3, %v1426_v11  ;;  %v1428_v8 = vsel %vm1340_vm2, %v1364_v17, %v1135_v40 }
 0x185   : > { %v1139_v43 = vpop.f32.mrf.mxu0 }
 0x186   : > { %v1140_v28 = vadd.f32 %v4429_v59, %v1139_v43  ;;  %v1427_v18 = vsel %vm1340_vm2, %v1363_v7, %v1130_v26  ;;  %v1366_v3 = vmax.f32 %v1145_v42, 0.0 }
 0x187   : > { %v3391_v29 = vpop.f32.mrf.mxu0  ;;  %3495 = vmatprep.mubr.msk.f32.mxu1 %vm1484_vm3, %v1427_v18 }
 0x188   : > { %v1365_v19 = vmax.f32 %v1140_v28, 0.0  ;;  %v1155_v44 = vadd.f32 %v3391_v29, %v4429_v59  ;;  %3496 = vmatmul.mubr.msk.f32.gmra.mxu1 %vm1484_vm3, %v1428_v8  ;;  %v1430_v31 = vsel %vm1340_vm2, %v1366_v3, %v1145_v42 }
 0x189   : > { %v1149_v45 = vpop.f32.mrf.mxu0 }
 0x18a   : > { %v1150_v30 = vadd.f32 %v4429_v59, %v1149_v45  ;;  %v1429_v12 = vsel %vm1340_vm2, %v1365_v19, %v1140_v28  ;;  %v1368_v57 = vmax.f32 %v1155_v44, 0.0 }
 0x18b   : > { %v3394_v0 = vpop.f32.mrf.mxu0  ;;  %3498 = vmatprep.mubr.msk.f32.mxu1 %vm1484_vm3, %v1429_v12 }
 0x18c   : > { %v1367_v20 = vmax.f32 %v1150_v30, 0.0  ;;  %v1165_v4 = vadd.f32 %v3394_v0, %v4429_v59  ;;  %3499 = vmatmul.mubr.msk.f32.gmra.mxu1 %vm1484_vm3, %v1430_v31  ;;  %v1432_v13 = vsel %vm1340_vm2, %v1368_v57, %v1155_v44 }
 0x18d   : > { %v1159_v46 = vpop.f32.mrf.mxu0 }
 0x18e   : > { %v1160_v47 = vadd.f32 %v4429_v59, %v1159_v46  ;;  %v1431_v5 = vsel %vm1340_vm2, %v1367_v20, %v1150_v30  ;;  %v1370_v56 = vmax.f32 %v1165_v4, 0.0 }
 0x18f   : > { %v3397_v32 = vpop.f32.mrf.mxu0  ;;  %3501 = vmatprep.mubr.msk.f32.mxu1 %vm1484_vm3, %v1431_v5 }
 0x190   : > { %v1369_v21 = vmax.f32 %v1160_v47, 0.0  ;;  %v1175_v1 = vadd.f32 %v3397_v32, %v4429_v59  ;;  %v3400_v33 = vpop.f32.mrf.mxu1  ;;  %3502 = vmatmul.mubr.msk.f32.gmra.mxu1 %vm1484_vm3, %v1432_v13  ;;  %v1434_v51 = vsel %vm1340_vm2, %v1370_v56, %v1165_v4 }
 0x191   : > { %v1169_v9 = vpop.f32.mrf.mxu0  ;;  %v1185_v49 = vadd.f32 %v3400_v33, %v4429_v59 }
 0x192   : > { %v1170_v60 = vadd.f32 %v4429_v59, %v1169_v9  ;;  %v1179_v22 = vpop.f32.mrf.mxu1  ;;  %v1433_v34 = vsel %vm1340_vm2, %v1369_v21, %v1160_v47  ;;  %v1372_v14 = vmax.f32 %v1175_v1, 0.0 }
 0x193   : > { %v1180_v50 = vadd.f32 %v4429_v59, %v1179_v22  ;;  %3504 = vmatprep.mubr.msk.f32.mxu1 %vm1484_vm3, %v1433_v34  ;;  %v1374_v6 = vmax.f32 %v1185_v49, 0.0 }
 0x194   : > { %v1371_v35 = vmax.f32 %v1170_v60, 0.0  ;;  %v3403_v61 = vpop.f32.mrf.mxu1  ;;  %3505 = vmatmul.mubr.msk.f32.gmra.mxu1 %vm1484_vm3, %v1434_v51  ;;  %v1436_v15 = vsel %vm1340_vm2, %v1372_v14, %v1175_v1 }
 0x195   : > { %v1373_v23 = vmax.f32 %v1180_v50, 0.0  ;;  %v1195_v36 = vadd.f32 %v3403_v61, %v4429_v59  ;;  %v1438_v55 = vsel %vm1340_vm2, %v1374_v6, %v1185_v49 }
 0x196   : > { %v1189_v52 = vpop.f32.mrf.mxu1  ;;  %v1435_v53 = vsel %vm1340_vm2, %v1371_v35, %v1170_v60 }
 0x197   : > { %v1190_v37 = vadd.f32 %v4429_v59, %v1189_v52  ;;  %3507 = vmatprep.mubr.msk.f32.mxu1 %vm1484_vm3, %v1435_v53  ;;  %v1437_v24 = vsel %vm1340_vm2, %v1373_v23, %v1180_v50  ;;  %v1376_v10 = vmax.f32 %v1195_v36, 0.0 }
 0x198   : > { %v3406_v38 = vpop.f32.mrf.mxu1  ;;  %3508 = vmatmul.mubr.msk.f32.gmra.mxu1 %vm1484_vm3, %v1436_v15 }
 0x199   : > { %v1375_v39 = vmax.f32 %v1190_v37, 0.0  ;;  %3510 = vmatprep.mubr.msk.f32.mxu1 %vm1484_vm3, %v1437_v24  ;;  %v1205_v58 = vadd.f32 %v3406_v38, %v4429_v59  ;;  %v1440_v17 = vsel %vm1340_vm2, %v1376_v10, %v1195_v36 }
 0x19a   : > { %v1199_v54 = vpop.f32.mrf.mxu1 }
 0x19b   : > { %v1200_v25 = vadd.f32 %v4429_v59, %v1199_v54  ;;  %v1439_v62 = vsel %vm1340_vm2, %v1375_v39, %v1190_v37  ;;  %v1378_v26 = vmax.f32 %v1205_v58, 0.0 }
 0x19c   : > { %v3409_v16 = vpop.f32.mrf.mxu1  ;;  %3511 = vmatmul.mubr.msk.f32.gmra.mxu1 %vm1484_vm3, %v1438_v55 }
 0x19d   : > { %v1377_v63 = vmax.f32 %v1200_v25, 0.0  ;;  %3513 = vmatprep.mubr.msk.f32.mxu1 %vm1484_vm3, %v1439_v62  ;;  %v1215_v40 = vadd.f32 %v3409_v16, %v4429_v59  ;;  %v1442_v3 = vsel %vm1340_vm2, %v1378_v26, %v1205_v58 }
 0x19e   : > { %v1209_v41 = vpop.f32.mrf.mxu1 }
 0x19f   : > { %v1210_v2 = vadd.f32 %v4429_v59, %v1209_v41  ;;  %v1441_v27 = vsel %vm1340_vm2, %v1377_v63, %v1200_v25  ;;  %v1380_v42 = vmax.f32 %v1215_v40, 0.0 }
 0x1a0   : > { %v3412_v11 = vpop.f32.mrf.mxu1  ;;  %3514 = vmatmul.mubr.msk.f32.gmra.mxu1 %vm1484_vm3, %v1440_v17 }
 0x1a1   : > { %v1379_v7 = vmax.f32 %v1210_v2, 0.0  ;;  %3516 = vmatprep.mubr.msk.f32.mxu1 %vm1484_vm3, %v1441_v27  ;;  %v1225_v28 = vadd.f32 %v3412_v11, %v4429_v59  ;;  %v1444_v45 = vsel %vm1340_vm2, %v1380_v42, %v1215_v40 }
 0x1a2   : > { %v1219_v43 = vpop.f32.mrf.mxu1 }
 0x1a3   : > { %v1220_v18 = vadd.f32 %v4429_v59, %v1219_v43  ;;  %v1443_v29 = vsel %vm1340_vm2, %v1379_v7, %v1210_v2  ;;  %v1382_v30 = vmax.f32 %v1225_v28, 0.0 }
 0x1a4   : > { %v3415_v8 = vpop.f32.mrf.mxu1  ;;  %3517 = vmatmul.mubr.msk.f32.gmra.mxu1 %vm1484_vm3, %v1442_v3 }
 0x1a5   : > { %v1381_v19 = vmax.f32 %v1220_v18, 0.0  ;;  %3519 = vmatprep.mubr.msk.f32.mxu1 %vm1484_vm3, %v1443_v29  ;;  %v1235_v12 = vadd.f32 %v3415_v8, %v4429_v59  ;;  %v1446_v56 = vsel %vm1340_vm2, %v1382_v30, %v1225_v28 }
 0x1a6   : > { %v1229_v44 = vpop.f32.mrf.mxu1 }
 0x1a7   : > { %v1230_v57 = vadd.f32 %v4429_v59, %v1229_v44  ;;  %v1445_v0 = vsel %vm1340_vm2, %v1381_v19, %v1220_v18  ;;  %v1384_v47 = vmax.f32 %v1235_v12, 0.0 }
 0x1a8   : > { %v3418_v31 = vpop.f32.mrf.mxu1  ;;  %3520 = vmatmul.mubr.msk.f32.gmra.mxu1 %vm1484_vm3, %v1444_v45 }
 0x1a9   : > { %v1383_v20 = vmax.f32 %v1230_v57, 0.0  ;;  %3522 = vmatprep.mubr.msk.f32.mxu1 %vm1484_vm3, %v1445_v0  ;;  %v1245_v4 = vadd.f32 %v3418_v31, %v4429_v59  ;;  %v1448_v60 = vsel %vm1340_vm2, %v1384_v47, %v1235_v12 }
 0x1aa   : > { %v1239_v46 = vpop.f32.mrf.mxu1 }
 0x1ab   : > { %v1240_v5 = vadd.f32 %v4429_v59, %v1239_v46  ;;  %v1447_v32 = vsel %vm1340_vm2, %v1383_v20, %v1230_v57  ;;  %v1386_v1 = vmax.f32 %v1245_v4, 0.0 }
 0x1ac   : > { %v3421_v13 = vpop.f32.mrf.mxu1  ;;  %3523 = vmatmul.mubr.msk.f32.gmra.mxu1 %vm1484_vm3, %v1446_v56 }
 0x1ad   : > { %v1385_v21 = vmax.f32 %v1240_v5, 0.0  ;;  %3525 = vmatprep.mubr.msk.f32.mxu1 %vm1484_vm3, %v1447_v32  ;;  %v1255_v9 = vadd.f32 %v3421_v13, %v4429_v59  ;;  %v1450_v51 = vsel %vm1340_vm2, %v1386_v1, %v1245_v4 }
 0x1ae   : > { %v1249_v33 = vpop.f32.mrf.mxu1 }
 0x1af   : > { %v1250_v49 = vadd.f32 %v4429_v59, %v1249_v33  ;;  %v1449_v22 = vsel %vm1340_vm2, %v1385_v21, %v1240_v5  ;;  %v1388_v35 = vmax.f32 %v1255_v9, 0.0 }
 0x1b0   : > { %v3424_v34 = vpop.f32.mrf.mxu1  ;;  %3526 = vmatmul.mubr.msk.f32.gmra.mxu1 %vm1484_vm3, %v1448_v60 }
 0x1b1   : > { %v1387_v14 = vmax.f32 %v1250_v49, 0.0  ;;  %3528 = vmatprep.mubr.msk.f32.mxu1 %vm1484_vm3, %v1449_v22  ;;  %v1265_v61 = vadd.f32 %v3424_v34, %v4429_v59  ;;  %v1452_v24 = vsel %vm1340_vm2, %v1388_v35, %v1255_v9 }
 0x1b2   : > { %v1259_v50 = vpop.f32.mrf.mxu1 }
 0x1b3   : > { %v1260_v23 = vadd.f32 %v4429_v59, %v1259_v50  ;;  %v1451_v6 = vsel %vm1340_vm2, %v1387_v14, %v1250_v49  ;;  %v1390_v15 = vmax.f32 %v1265_v61, 0.0 }
 0x1b4   : > { %3529 = vmatmul.mubr.msk.f32.gmra.mxu1 %vm1484_vm3, %v1450_v51  ;;  %v3427_v52 = vpop.f32.mrf.mxu1 }
 0x1b5   : > { %v1389_v53 = vmax.f32 %v1260_v23, 0.0  ;;  %3531 = vmatprep.mubr.msk.f32.mxu1 %vm1484_vm3, %v1451_v6  ;;  %v1275_v36 = vadd.f32 %v3427_v52, %v4429_v59  ;;  %v1454_v62 = vsel %vm1340_vm2, %v1390_v15, %v1265_v61 }
 0x1b6   : > { %v1269_v37 = vpop.f32.mrf.mxu1 }
 0x1b7   : > { %v1270_v38 = vadd.f32 %v4429_v59, %v1269_v37  ;;  %v1453_v39 = vsel %vm1340_vm2, %v1389_v53, %v1260_v23  ;;  %v1392_v55 = vmax.f32 %v1275_v36, 0.0 }
 0x1b8   : > { %3532 = vmatmul.mubr.msk.f32.gmra.mxu1 %vm1484_vm3, %v1452_v24  ;;  %v3430_v54 = vpop.f32.mrf.mxu1 }
 0x1b9   : > { %v1391_v10 = vmax.f32 %v1270_v38, 0.0  ;;  %3534 = vmatprep.mubr.msk.f32.mxu1 %vm1484_vm3, %v1453_v39  ;;  %v1285_v58 = vadd.f32 %v3430_v54, %v4429_v59  ;;  %v1456_v2 = vsel %vm1340_vm2, %v1392_v55, %v1275_v36 }
 0x1ba   : > { %v1279_v25 = vpop.f32.mrf.mxu1 }
 0x1bb   : > { %v1280_v16 = vadd.f32 %v4429_v59, %v1279_v25  ;;  %v1455_v63 = vsel %vm1340_vm2, %v1391_v10, %v1270_v38  ;;  %v1394_v41 = vmax.f32 %v1285_v58, 0.0 }
 0x1bc   : > { %3535 = vmatmul.mubr.msk.f32.gmra.mxu1 %vm1484_vm3, %v1454_v62  ;;  %v3433_v40 = vpop.f32.mrf.mxu1 }
 0x1bd   : > { %v1393_v26 = vmax.f32 %v1280_v16, 0.0  ;;  %3537 = vmatprep.mubr.msk.f32.mxu1 %vm1484_vm3, %v1455_v63  ;;  %v1295_v17 = vadd.f32 %v3433_v40, %v4429_v59  ;;  %v1458_v18 = vsel %vm1340_vm2, %v1394_v41, %v1285_v58 }
 0x1be   : > { %v1289_v27 = vpop.f32.mrf.mxu1 }
 0x1bf   : > { %v1290_v11 = vadd.f32 %v4429_v59, %v1289_v27  ;;  %v1457_v7 = vsel %vm1340_vm2, %v1393_v26, %v1280_v16  ;;  %v1396_v43 = vmax.f32 %v1295_v17, 0.0 }
 0x1c0   : > { %3538 = vmatmul.mubr.msk.f32.gmra.mxu1 %vm1484_vm3, %v1456_v2  ;;  %v3436_v42 = vpop.f32.mrf.mxu1 }
 0x1c1   : > { %v1395_v28 = vmax.f32 %v1290_v11, 0.0  ;;  %3540 = vmatprep.mubr.msk.f32.mxu1 %vm1484_vm3, %v1457_v7  ;;  %v1305_v3 = vadd.f32 %v3436_v42, %v4429_v59  ;;  %v1460_v30 = vsel %vm1340_vm2, %v1396_v43, %v1295_v17 }
 0x1c2   : > { %v1299_v29 = vpop.f32.mrf.mxu1 }
 0x1c3   : > { %v1459_v8 = vsel %vm1340_vm2, %v1395_v28, %v1290_v11  ;;  %v1300_v19 = vadd.f32 %v4429_v59, %v1299_v29  ;;  %v1398_v45 = vmax.f32 %v1305_v3, 0.0 }
 0x1c4   : > { %3541 = vmatmul.mubr.msk.f32.gmra.mxu1 %vm1484_vm3, %v1458_v18  ;;  %v3439_v44 = vpop.f32.mrf.mxu1 }
 0x1c5   : > { %3543 = vmatprep.mubr.msk.f32.mxu1 %vm1484_vm3, %v1459_v8  ;;  %v1397_v12 = vmax.f32 %v1300_v19, 0.0  ;;  %v1315_v57 = vadd.f32 %v3439_v44, %v4429_v59  ;;  %v1462_v47 = vsel %vm1340_vm2, %v1398_v45, %v1305_v3 }
 0x1c6   : > { %v1309_v0 = vpop.f32.mrf.mxu1 }
 0x1c7   : > { %v1461_v31 = vsel %vm1340_vm2, %v1397_v12, %v1300_v19  ;;  %v1310_v20 = vadd.f32 %v4429_v59, %v1309_v0  ;;  %v1400_v46 = vmax.f32 %v1315_v57, 0.0 }
 0x1c8   : > { %3544 = vmatmul.mubr.msk.f32.gmra.mxu1 %vm1484_vm3, %v1460_v30  ;;  %v3442_v4 = vpop.f32.mrf.mxu1 }
 0x1c9   : > { %3546 = vmatprep.mubr.msk.f32.mxu1 %vm1484_vm3, %v1461_v31  ;;  %v1399_v5 = vmax.f32 %v1310_v20, 0.0  ;;  %v1325_v56 = vadd.f32 %v3442_v4, %v4429_v59  ;;  %v1464_v9 = vsel %vm1340_vm2, %v1400_v46, %v1315_v57 }
 0x1ca   : > { %v1319_v32 = vpop.f32.mrf.mxu1 }
 0x1cb   : > { %v1463_v13 = vsel %vm1340_vm2, %v1399_v5, %v1310_v20  ;;  %v1320_v21 = vadd.f32 %v4429_v59, %v1319_v32  ;;  %v1402_v33 = vmax.f32 %v1325_v56, 0.0 }
 0x1cc   : > { %3547 = vmatmul.mubr.msk.f32.gmra.mxu1 %vm1484_vm3, %v1462_v47  ;;  %v3445_v1 = vpop.f32.mrf.mxu1 }
 0x1cd   : > { %3549 = vmatprep.mubr.msk.f32.mxu1 %vm1484_vm3, %v1463_v13  ;;  %v1401_v49 = vmax.f32 %v1320_v21, 0.0  ;;  %v1335_v60 = vadd.f32 %v3445_v1, %v4429_v59  ;;  %v1466_v51 = vsel %vm1340_vm2, %v1402_v33, %v1325_v56 }
 0x1ce   : > { %v1329_v22 = vpop.f32.mrf.mxu1 }
 0x1cf   : > { %v1465_v34 = vsel %vm1340_vm2, %v1401_v49, %v1320_v21  ;;  %v1330_v14 = vadd.f32 %v4429_v59, %v1329_v22  ;;  %v1404_v50 = vmax.f32 %v1335_v60, 0.0  ;;  %v4705_v59 = vld [vmem:[%s4972_s4] ss:$0 sm:$0xff] }
 0x1d0   : > { %3550 = vmatmul.mubr.msk.f32.gmra.mxu1 %vm1484_vm3, %v1464_v9 }
 0x1d1   : > { %3552 = vmatprep.mubr.msk.f32.mxu1 %vm1484_vm3, %v1465_v34  ;;  %v1403_v35 = vmax.f32 %v1330_v14, 0.0  ;;  %v1468_v23 = vsel %vm1340_vm2, %v1404_v50, %v1335_v60 }
 0x1d3   : > { %v1467_v61 = vsel %vm1340_vm2, %v1403_v35, %v1330_v14 }
 0x1d4   : > { %3553 = vmatmul.mubr.msk.f32.gmra.mxu1 %vm1484_vm3, %v1466_v51 }
 0x1d5   : > { %3555 = vmatprep.mubr.msk.f32.mxu1 %vm1484_vm3, %v1467_v61 }
 0x1d8   : > { %3556 = vmatmul.mubr.msk.f32.gmra.mxu1 %vm1484_vm3, %v1468_v23 }
 0x21c   : > { %v3464_v6 = vpop.f32.mrf.mxu1 }
 0x21d   : > { %v1749_v52 = vadd.f32 %v3464_v6, %v4705_v59 }
 0x21e   : > { %v1743_v53 = vpop.f32.mrf.mxu1 }
 0x21f   : > { %v1744_v36 = vadd.f32 %v4705_v59, %v1743_v53  ;;  %v2063_v24 = vmax.f32 %v1749_v52, 0.0 }
 0x220   : > { %v3467_v37 = vpop.f32.mrf.mxu1 }
 0x221   : > { %v2062_v15 = vmax.f32 %v1744_v36, 0.0  ;;  %v1759_v38 = vadd.f32 %v3467_v37, %v4705_v59 }
 0x222   : > { %v1753_v48 = vpop.f32.mrf.mxu1 }
 0x223   : > { %v1754_v39 = vadd.f32 %v4705_v59, %v1753_v48  ;;  %3566 = vmatprep.mubr.msk.f32.mxu0 %vm760_vm1, %v2062_v15  ;;  %v2065_v10 = vmax.f32 %v1759_v38, 0.0 }
 0x224   : > { %v3470_v54 = vpop.f32.mrf.mxu1  ;;  %3567 = vmatmul.mubr.msk.f32.vlgmr.msra.gmra.mxu0 %vm760_vm1, %v2063_v24 }
 0x225   : > { %v2064_v55 = vmax.f32 %v1754_v39, 0.0  ;;  %v1769_v58 = vadd.f32 %v3470_v54, %v4705_v59 }
 0x226   : > { %v1763_v25 = vpop.f32.mrf.mxu1 }
 0x227   : > { %v1764_v62 = vadd.f32 %v4705_v59, %v1763_v25  ;;  %3569 = vmatprep.mubr.msk.f32.mxu0 %vm760_vm1, %v2064_v55  ;;  %v2067_v40 = vmax.f32 %v1769_v58, 0.0 }
 0x228   : > { %v3473_v16 = vpop.f32.mrf.mxu1  ;;  %3570 = vmatmul.mubr.msk.f32.gmra.mxu0 %vm760_vm1, %v2065_v10 }
 0x229   : > { %v2066_v63 = vmax.f32 %v1764_v62, 0.0  ;;  %v1779_v41 = vadd.f32 %v3473_v16, %v4705_v59 }
 0x22a   : > { %v1773_v26 = vpop.f32.mrf.mxu1 }
 0x22b   : > { %v1774_v2 = vadd.f32 %v4705_v59, %v1773_v26  ;;  %3572 = vmatprep.mubr.msk.f32.mxu0 %vm760_vm1, %v2066_v63  ;;  %v2069_v11 = vmax.f32 %v1779_v41, 0.0 }
 0x22c   : > { %v3476_v17 = vpop.f32.mrf.mxu1  ;;  %3573 = vmatmul.mubr.msk.f32.gmra.mxu0 %vm760_vm1, %v2067_v40 }
 0x22d   : > { %v2068_v27 = vmax.f32 %v1774_v2, 0.0  ;;  %v1789_v7 = vadd.f32 %v3476_v17, %v4705_v59 }
 0x22e   : > { %v1783_v42 = vpop.f32.mrf.mxu1 }
 0x22f   : > { %v1784_v43 = vadd.f32 %v4705_v59, %v1783_v42  ;;  %3575 = vmatprep.mubr.msk.f32.mxu0 %vm760_vm1, %v2068_v27  ;;  %v2071_v3 = vmax.f32 %v1789_v7, 0.0 }
 0x230   : > { %v3479_v28 = vpop.f32.mrf.mxu1  ;;  %3576 = vmatmul.mubr.msk.f32.gmra.mxu0 %vm760_vm1, %v2069_v11 }
 0x231   : > { %v2070_v18 = vmax.f32 %v1784_v43, 0.0  ;;  %v1799_v29 = vadd.f32 %v3479_v28, %v4705_v59 }
 0x232   : > { %v1793_v8 = vpop.f32.mrf.mxu1 }
 0x233   : > { %v1794_v19 = vadd.f32 %v4705_v59, %v1793_v8  ;;  %3578 = vmatprep.mubr.msk.f32.mxu0 %vm760_vm1, %v2070_v18  ;;  %v2073_v30 = vmax.f32 %v1799_v29, 0.0 }
 0x234   : > { %v3482_v44 = vpop.f32.mrf.mxu1  ;;  %3579 = vmatmul.mubr.msk.f32.gmra.mxu0 %vm760_vm1, %v2071_v3 }
 0x235   : > { %v2072_v45 = vmax.f32 %v1794_v19, 0.0  ;;  %v1809_v12 = vadd.f32 %v3482_v44, %v4705_v59 }
 0x236   : > { %v1803_v57 = vpop.f32.mrf.mxu1 }
 0x237   : > { %v1804_v0 = vadd.f32 %v4705_v59, %v1803_v57  ;;  %3581 = vmatprep.mubr.msk.f32.mxu0 %vm760_vm1, %v2072_v45  ;;  %v2075_v4 = vmax.f32 %v1809_v12, 0.0 }
 0x238   : > { %v3485_v31 = vpop.f32.mrf.mxu1  ;;  %3582 = vmatmul.mubr.msk.f32.gmra.mxu0 %vm760_vm1, %v2073_v30 }
 0x239   : > { %v2074_v20 = vmax.f32 %v1804_v0, 0.0  ;;  %v1819_v46 = vadd.f32 %v3485_v31, %v4705_v59 }
 0x23a   : > { %v1813_v47 = vpop.f32.mrf.mxu1 }
 0x23b   : > { %v1814_v5 = vadd.f32 %v4705_v59, %v1813_v47  ;;  %3584 = vmatprep.mubr.msk.f32.mxu0 %vm760_vm1, %v2074_v20  ;;  %v2077_v13 = vmax.f32 %v1819_v46, 0.0 }
 0x23c   : > { %v3488_v56 = vpop.f32.mrf.mxu1  ;;  %3585 = vmatmul.mubr.msk.f32.gmra.mxu0 %vm760_vm1, %v2075_v4 }
 0x23d   : > { %v2076_v32 = vmax.f32 %v1814_v5, 0.0  ;;  %v1829_v21 = vadd.f32 %v3488_v56, %v4705_v59 }
 0x23e   : > { %v1823_v1 = vpop.f32.mrf.mxu1 }
 0x23f   : > { %v1824_v33 = vadd.f32 %v4705_v59, %v1823_v1  ;;  %3587 = vmatprep.mubr.msk.f32.mxu0 %vm760_vm1, %v2076_v32  ;;  %v2079_v60 = vmax.f32 %v1829_v21, 0.0 }
 0x240   : > { %v3491_v9 = vpop.f32.mrf.mxu1  ;;  %3588 = vmatmul.mubr.msk.f32.gmra.mxu0 %vm760_vm1, %v2077_v13 }
 0x241   : > { %v2078_v49 = vmax.f32 %v1824_v33, 0.0  ;;  %v1839_v22 = vadd.f32 %v3491_v9, %v4705_v59 }
 0x242   : > { %v1833_v34 = vpop.f32.mrf.mxu1 }
 0x243   : > { %v1834_v14 = vadd.f32 %v4705_v59, %v1833_v34  ;;  %3590 = vmatprep.mubr.msk.f32.mxu0 %vm760_vm1, %v2078_v49  ;;  %v2081_v35 = vmax.f32 %v1839_v22, 0.0 }
 0x244   : > { %v3494_v50 = vpop.f32.mrf.mxu1  ;;  %3591 = vmatmul.mubr.msk.f32.gmra.mxu0 %vm760_vm1, %v2079_v60 }
 0x245   : > { %v2080_v51 = vmax.f32 %v1834_v14, 0.0  ;;  %v1849_v61 = vadd.f32 %v3494_v50, %v4705_v59 }
 0x246   : > { %v1843_v23 = vpop.f32.mrf.mxu1 }
 0x247   : > { %v1844_v6 = vadd.f32 %v4705_v59, %v1843_v23  ;;  %3593 = vmatprep.mubr.msk.f32.mxu0 %vm760_vm1, %v2080_v51  ;;  %v2083_v36 = vmax.f32 %v1849_v61, 0.0 }
 0x248   : > { %v3497_v52 = vpop.f32.mrf.mxu1  ;;  %3594 = vmatmul.mubr.msk.f32.gmra.mxu0 %vm760_vm1, %v2081_v35 }
 0x249   : > { %v2082_v53 = vmax.f32 %v1844_v6, 0.0  ;;  %v1859_v37 = vadd.f32 %v3497_v52, %v4705_v59 }
 0x24a   : > { %v1853_v15 = vpop.f32.mrf.mxu1 }
 0x24b   : > { %v1854_v24 = vadd.f32 %v4705_v59, %v1853_v15  ;;  %3596 = vmatprep.mubr.msk.f32.mxu0 %vm760_vm1, %v2082_v53  ;;  %v2085_v39 = vmax.f32 %v1859_v37, 0.0 }
 0x24c   : > { %v3500_v38 = vpop.f32.mrf.mxu1  ;;  %3597 = vmatmul.mubr.msk.f32.gmra.mxu0 %vm760_vm1, %v2083_v36 }
 0x24d   : > { %v2084_v48 = vmax.f32 %v1854_v24, 0.0  ;;  %v1869_v54 = vadd.f32 %v3500_v38, %v4705_v59 }
 0x24e   : > { %v1863_v55 = vpop.f32.mrf.mxu1 }
 0x24f   : > { %v1864_v10 = vadd.f32 %v4705_v59, %v1863_v55  ;;  %3599 = vmatprep.mubr.msk.f32.mxu0 %vm760_vm1, %v2084_v48  ;;  %v2087_v62 = vmax.f32 %v1869_v54, 0.0 }
 0x250   : > { %v3503_v58 = vpop.f32.mrf.mxu1  ;;  %3600 = vmatmul.mubr.msk.f32.gmra.mxu0 %vm760_vm1, %v2085_v39 }
 0x251   : > { %v2086_v25 = vmax.f32 %v1864_v10, 0.0  ;;  %v1879_v16 = vadd.f32 %v3503_v58, %v4705_v59 }
 0x252   : > { %v1873_v63 = vpop.f32.mrf.mxu1 }
 0x253   : > { %v1874_v40 = vadd.f32 %v4705_v59, %v1873_v63  ;;  %3602 = vmatprep.mubr.msk.f32.mxu0 %vm760_vm1, %v2086_v25  ;;  %v2089_v2 = vmax.f32 %v1879_v16, 0.0 }
 0x254   : > { %v3506_v41 = vpop.f32.mrf.mxu1  ;;  %3603 = vmatmul.mubr.msk.f32.gmra.mxu0 %vm760_vm1, %v2087_v62 }
 0x255   : > { %v2088_v26 = vmax.f32 %v1874_v40, 0.0  ;;  %v1889_v17 = vadd.f32 %v3506_v41, %v4705_v59 }
 0x256   : > { %v1883_v27 = vpop.f32.mrf.mxu1 }
 0x257   : > { %v1884_v11 = vadd.f32 %v4705_v59, %v1883_v27  ;;  %3605 = vmatprep.mubr.msk.f32.mxu0 %vm760_vm1, %v2088_v26  ;;  %v2091_v43 = vmax.f32 %v1889_v17, 0.0 }
 0x258   : > { %v3509_v7 = vpop.f32.mrf.mxu1  ;;  %3606 = vmatmul.mubr.msk.f32.gmra.mxu0 %vm760_vm1, %v2089_v2 }
 0x259   : > { %v2090_v42 = vmax.f32 %v1884_v11, 0.0  ;;  %v1899_v28 = vadd.f32 %v3509_v7, %v4705_v59 }
 0x25a   : > { %v1893_v18 = vpop.f32.mrf.mxu1 }
 0x25b   : > { %v1894_v3 = vadd.f32 %v4705_v59, %v1893_v18  ;;  %3608 = vmatprep.mubr.msk.f32.mxu0 %vm760_vm1, %v2090_v42  ;;  %v2093_v19 = vmax.f32 %v1899_v28, 0.0 }
 0x25c   : > { %v3512_v29 = vpop.f32.mrf.mxu1  ;;  %3609 = vmatmul.mubr.msk.f32.gmra.mxu0 %vm760_vm1, %v2091_v43 }
 0x25d   : > { %v2092_v8 = vmax.f32 %v1894_v3, 0.0  ;;  %v1909_v44 = vadd.f32 %v3512_v29, %v4705_v59 }
 0x25e   : > { %v1903_v45 = vpop.f32.mrf.mxu1 }
 0x25f   : > { %v1904_v30 = vadd.f32 %v4705_v59, %v1903_v45  ;;  %3611 = vmatprep.mubr.msk.f32.mxu0 %vm760_vm1, %v2092_v8  ;;  %v2095_v0 = vmax.f32 %v1909_v44, 0.0 }
 0x260   : > { %v3515_v12 = vpop.f32.mrf.mxu1  ;;  %3612 = vmatmul.mubr.msk.f32.gmra.mxu0 %vm760_vm1, %v2093_v19 }
 0x261   : > { %v2094_v57 = vmax.f32 %v1904_v30, 0.0  ;;  %v1919_v31 = vadd.f32 %v3515_v12, %v4705_v59 }
 0x262   : > { %v1913_v20 = vpop.f32.mrf.mxu1 }
 0x263   : > { %v1914_v4 = vadd.f32 %v4705_v59, %v1913_v20  ;;  %3614 = vmatprep.mubr.msk.f32.mxu0 %vm760_vm1, %v2094_v57  ;;  %v2097_v5 = vmax.f32 %v1919_v31, 0.0 }
 0x264   : > { %v3518_v46 = vpop.f32.mrf.mxu1  ;;  %3615 = vmatmul.mubr.msk.f32.gmra.mxu0 %vm760_vm1, %v2095_v0 }
 0x265   : > { %v2096_v47 = vmax.f32 %v1914_v4, 0.0  ;;  %v1929_v56 = vadd.f32 %v3518_v46, %v4705_v59 }
 0x266   : > { %v1923_v32 = vpop.f32.mrf.mxu1 }
 0x267   : > { %v1924_v13 = vadd.f32 %v4705_v59, %v1923_v32  ;;  %3617 = vmatprep.mubr.msk.f32.mxu0 %vm760_vm1, %v2096_v47  ;;  %v2099_v33 = vmax.f32 %v1929_v56, 0.0 }
 0x268   : > { %v3521_v21 = vpop.f32.mrf.mxu1  ;;  %3618 = vmatmul.mubr.msk.f32.gmra.mxu0 %vm760_vm1, %v2097_v5 }
 0x269   : > { %v2098_v1 = vmax.f32 %v1924_v13, 0.0  ;;  %v1939_v9 = vadd.f32 %v3521_v21, %v4705_v59 }
 0x26a   : > { %v1933_v49 = vpop.f32.mrf.mxu1 }
 0x26b   : > { %v1934_v60 = vadd.f32 %v4705_v59, %v1933_v49  ;;  %3620 = vmatprep.mubr.msk.f32.mxu0 %vm760_vm1, %v2098_v1  ;;  %v2101_v14 = vmax.f32 %v1939_v9, 0.0 }
 0x26c   : > { %v3524_v22 = vpop.f32.mrf.mxu1  ;;  %3621 = vmatmul.mubr.msk.f32.gmra.mxu0 %vm760_vm1, %v2099_v33 }
 0x26d   : > { %v2100_v34 = vmax.f32 %v1934_v60, 0.0  ;;  %v1949_v50 = vadd.f32 %v3524_v22, %v4705_v59 }
 0x26e   : > { %v1943_v51 = vpop.f32.mrf.mxu1 }
 0x26f   : > { %v1944_v35 = vadd.f32 %v4705_v59, %v1943_v51  ;;  %3623 = vmatprep.mubr.msk.f32.mxu0 %vm760_vm1, %v2100_v34  ;;  %v2103_v6 = vmax.f32 %v1949_v50, 0.0 }
 0x270   : > { %v3527_v61 = vpop.f32.mrf.mxu1  ;;  %3624 = vmatmul.mubr.msk.f32.gmra.mxu0 %vm760_vm1, %v2101_v14 }
 0x271   : > { %v2102_v23 = vmax.f32 %v1944_v35, 0.0  ;;  %v1959_v52 = vadd.f32 %v3527_v61, %v4705_v59 }
 0x272   : > { %v1953_v53 = vpop.f32.mrf.mxu1 }
 0x273   : > { %v1954_v36 = vadd.f32 %v4705_v59, %v1953_v53  ;;  %3626 = vmatprep.mubr.msk.f32.mxu0 %vm760_vm1, %v2102_v23  ;;  %v2105_v24 = vmax.f32 %v1959_v52, 0.0 }
 0x274   : > { %v3530_v37 = vpop.f32.mrf.mxu1  ;;  %3627 = vmatmul.mubr.msk.f32.gmra.mxu0 %vm760_vm1, %v2103_v6 }
 0x275   : > { %v2104_v15 = vmax.f32 %v1954_v36, 0.0  ;;  %v1969_v38 = vadd.f32 %v3530_v37, %v4705_v59  ;;  %v4838_v37 = vld [vmem:[%s4974_s6] ss:$0 sm:$0xff] }
 0x276   : > { %v1963_v48 = vpop.f32.mrf.mxu1 }
 0x277   : > { %v1964_v39 = vadd.f32 %v4705_v59, %v1963_v48  ;;  %3629 = vmatprep.mubr.msk.f32.mxu0 %vm760_vm1, %v2104_v15  ;;  %v2107_v10 = vmax.f32 %v1969_v38, 0.0 }
 0x278   : > { %v3533_v54 = vpop.f32.mrf.mxu1  ;;  %3630 = vmatmul.mubr.msk.f32.gmra.mxu0 %vm760_vm1, %v2105_v24 }
 0x279   : > { %v2106_v55 = vmax.f32 %v1964_v39, 0.0  ;;  %v1979_v58 = vadd.f32 %v3533_v54, %v4705_v59 }
 0x27a   : > { %v1973_v25 = vpop.f32.mrf.mxu1 }
 0x27b   : > { %v1974_v62 = vadd.f32 %v4705_v59, %v1973_v25  ;;  %3632 = vmatprep.mubr.msk.f32.mxu0 %vm760_vm1, %v2106_v55  ;;  %v2109_v40 = vmax.f32 %v1979_v58, 0.0 }
 0x27c   : > { %v3536_v16 = vpop.f32.mrf.mxu1  ;;  %3633 = vmatmul.mubr.msk.f32.gmra.mxu0 %vm760_vm1, %v2107_v10 }
 0x27d   : > { %v2108_v63 = vmax.f32 %v1974_v62, 0.0  ;;  %v1989_v41 = vadd.f32 %v3536_v16, %v4705_v59 }
 0x27e   : > { %v1983_v26 = vpop.f32.mrf.mxu1 }
 0x27f   : > { %v1984_v2 = vadd.f32 %v4705_v59, %v1983_v26  ;;  %3635 = vmatprep.mubr.msk.f32.mxu0 %vm760_vm1, %v2108_v63  ;;  %v2111_v11 = vmax.f32 %v1989_v41, 0.0 }
 0x280   : > { %v3539_v17 = vpop.f32.mrf.mxu1  ;;  %3636 = vmatmul.mubr.msk.f32.gmra.mxu0 %vm760_vm1, %v2109_v40 }
 0x281   : > { %v2110_v27 = vmax.f32 %v1984_v2, 0.0  ;;  %v1999_v7 = vadd.f32 %v3539_v17, %v4705_v59 }
 0x282   : > { %v1993_v42 = vpop.f32.mrf.mxu1 }
 0x283   : > { %v1994_v43 = vadd.f32 %v4705_v59, %v1993_v42  ;;  %3638 = vmatprep.mubr.msk.f32.mxu0 %vm760_vm1, %v2110_v27  ;;  %v2113_v29 = vmax.f32 %v1999_v7, 0.0 }
 0x284   : > { %v3542_v28 = vpop.f32.mrf.mxu1  ;;  %3639 = vmatmul.mubr.msk.f32.gmra.mxu0 %vm760_vm1, %v2111_v11 }
 0x285   : > { %v2112_v18 = vmax.f32 %v1994_v43, 0.0  ;;  %v2009_v3 = vadd.f32 %v3542_v28, %v4705_v59 }
 0x286   : > { %v2003_v8 = vpop.f32.mrf.mxu1 }
 0x287   : > { %v2004_v19 = vadd.f32 %v4705_v59, %v2003_v8  ;;  %3641 = vmatprep.mubr.msk.f32.mxu0 %vm760_vm1, %v2112_v18  ;;  %v2115_v44 = vmax.f32 %v2009_v3, 0.0 }
 0x288   : > { %3642 = vmatmul.mubr.msk.f32.gmra.mxu0 %vm760_vm1, %v2113_v29  ;;  %v3545_v45 = vpop.f32.mrf.mxu1 }
 0x289   : > { %v2114_v30 = vmax.f32 %v2004_v19, 0.0  ;;  %v2019_v12 = vadd.f32 %v3545_v45, %v4705_v59 }
 0x28a   : > { %v2013_v57 = vpop.f32.mrf.mxu1 }
 0x28b   : > { %3644 = vmatprep.mubr.msk.f32.mxu0 %vm760_vm1, %v2114_v30  ;;  %v2014_v0 = vadd.f32 %v4705_v59, %v2013_v57  ;;  %v2117_v31 = vmax.f32 %v2019_v12, 0.0 }
 0x28c   : > { %3645 = vmatmul.mubr.msk.f32.gmra.mxu0 %vm760_vm1, %v2115_v44  ;;  %v3548_v20 = vpop.f32.mrf.mxu1 }
 0x28d   : > { %v2116_v4 = vmax.f32 %v2014_v0, 0.0  ;;  %v2029_v46 = vadd.f32 %v3548_v20, %v4705_v59 }
 0x28e   : > { %v2023_v47 = vpop.f32.mrf.mxu1 }
 0x28f   : > { %3647 = vmatprep.mubr.msk.f32.mxu0 %vm760_vm1, %v2116_v4  ;;  %v2024_v5 = vadd.f32 %v4705_v59, %v2023_v47  ;;  %v2119_v56 = vmax.f32 %v2029_v46, 0.0 }
 0x290   : > { %3648 = vmatmul.mubr.msk.f32.gmra.mxu0 %vm760_vm1, %v2117_v31  ;;  %v3551_v32 = vpop.f32.mrf.mxu1 }
 0x291   : > { %v2118_v13 = vmax.f32 %v2024_v5, 0.0  ;;  %v2039_v21 = vadd.f32 %v3551_v32, %v4705_v59 }
 0x292   : > { %v2033_v1 = vpop.f32.mrf.mxu1 }
 0x293   : > { %3650 = vmatprep.mubr.msk.f32.mxu0 %vm760_vm1, %v2118_v13  ;;  %v2034_v33 = vadd.f32 %v4705_v59, %v2033_v1  ;;  %v2121_v9 = vmax.f32 %v2039_v21, 0.0 }
 0x294   : > { %3651 = vmatmul.mubr.msk.f32.gmra.mxu0 %vm760_vm1, %v2119_v56  ;;  %v3554_v49 = vpop.f32.mrf.mxu1 }
 0x295   : > { %v2120_v60 = vmax.f32 %v2034_v33, 0.0  ;;  %v2049_v22 = vadd.f32 %v3554_v49, %v4705_v59 }
 0x296   : > { %v2043_v34 = vpop.f32.mrf.mxu1 }
 0x297   : > { %3653 = vmatprep.mubr.msk.f32.mxu0 %vm760_vm1, %v2120_v60  ;;  %v2044_v14 = vadd.f32 %v4705_v59, %v2043_v34  ;;  %v2123_v50 = vmax.f32 %v2049_v22, 0.0 }
 0x298   : > { %3654 = vmatmul.mubr.msk.f32.gmra.mxu0 %vm760_vm1, %v2121_v9  ;;  %v3557_v51 = vpop.f32.mrf.mxu1 }
 0x299   : > { %v2122_v35 = vmax.f32 %v2044_v14, 0.0  ;;  %v2059_v61 = vadd.f32 %v3557_v51, %v4705_v59 }
 0x29a   : > { %v2053_v23 = vpop.f32.mrf.mxu1 }
 0x29b   : > { %3656 = vmatprep.mubr.msk.f32.mxu0 %vm760_vm1, %v2122_v35  ;;  %v2054_v6 = vadd.f32 %v4705_v59, %v2053_v23  ;;  %v2125_v52 = vmax.f32 %v2059_v61, 0.0 }
 0x29c   : > { %3657 = vmatmul.mubr.msk.f32.gmra.mxu0 %vm760_vm1, %v2123_v50 }
 0x29d   : > { %v2124_v53 = vmax.f32 %v2054_v6, 0.0 }
 0x29f   : > { %3659 = vmatprep.mubr.msk.f32.mxu0 %vm760_vm1, %v2124_v53 }
 0x2a0   : > { %3660 = vmatmul.mubr.msk.f32.gmra.mxu0 %vm760_vm1, %v2125_v52 }
 0x2e4   : > { %v3568_v36 = vpop.f32.mrf.mxu0 }
 0x2e5   : > { %v2401_v48 = vadd.f32 %v3568_v36, %v4838_v37 }
 0x2e6   : > { %v2395_v15 = vpop.f32.mrf.mxu0 }
 0x2e7   : > { %v2396_v24 = vadd.f32 %v4838_v37, %v2395_v15 }
 0x2e8   : > { %v3571_v38 = vpop.f32.mrf.mxu0 }
 0x2e9   : > { %2714 = vxpose.xlu0.b32.start [1/16] (narrow) %v2396_v24, 16  ;;  %v2411_v25 = vadd.f32 %v3571_v38, %v4838_v37 }
 0x2ea   : > { %v2405_v59 = vpop.f32.mrf.mxu0 }
 0x2eb   : > { %v2406_v55 = vadd.f32 %v4838_v37, %v2405_v59 }
 0x2ec   : > { %v3574_v39 = vpop.f32.mrf.mxu0 }
 0x2ed   : > { %2715 = vxpose.xlu0.b32.cont [2/16] (narrow) %v2401_v48, 16  ;;  %v2421_v26 = vadd.f32 %v3574_v39, %v4838_v37 }
 0x2ee   : > { %v2415_v54 = vpop.f32.mrf.mxu0 }
 0x2ef   : > { %v2416_v63 = vadd.f32 %v4838_v37, %v2415_v54 }
 0x2f0   : > { %v3577_v10 = vpop.f32.mrf.mxu0 }
 0x2f1   : > { %2716 = vxpose.xlu0.b32.cont [3/16] (narrow) %v2406_v55, 16  ;;  %v2431_v42 = vadd.f32 %v3577_v10, %v4838_v37 }
 0x2f2   : > { %v2425_v58 = vpop.f32.mrf.mxu0 }
 0x2f3   : > { %v2426_v27 = vadd.f32 %v4838_v37, %v2425_v58 }
 0x2f4   : > { %v3580_v62 = vpop.f32.mrf.mxu0 }
 0x2f5   : > { %2717 = vxpose.xlu0.b32.cont [4/16] (narrow) %v2411_v25, 16  ;;  %v2441_v19 = vadd.f32 %v3580_v62, %v4838_v37 }
 0x2f6   : > { %v2435_v16 = vpop.f32.mrf.mxu0 }
 0x2f7   : > { %v2436_v18 = vadd.f32 %v4838_v37, %v2435_v16 }
 0x2f8   : > { %v3583_v40 = vpop.f32.mrf.mxu0 }
 0x2f9   : > { %2718 = vxpose.xlu0.b32.cont [5/16] (narrow) %v2416_v63, 16  ;;  %v2451_v20 = vadd.f32 %v3583_v40, %v4838_v37 }
 0x2fa   : > { %v2445_v41 = vpop.f32.mrf.mxu0 }
 0x2fb   : > { %v2446_v12 = vadd.f32 %v4838_v37, %v2445_v41 }
 0x2fc   : > { %v3586_v2 = vpop.f32.mrf.mxu0 }
 0x2fd   : > { %2719 = vxpose.xlu0.b32.cont [6/16] (narrow) %v2421_v26, 16  ;;  %v2461_v21 = vadd.f32 %v3586_v2, %v4838_v37 }
 0x2fe   : > { %v2455_v17 = vpop.f32.mrf.mxu0 }
 0x2ff   : > { %v2456_v5 = vadd.f32 %v4838_v37, %v2455_v17 }
 0x300   : > { %v3589_v11 = vpop.f32.mrf.mxu0 }
 0x301   : > { %2720 = vxpose.xlu0.b32.cont [7/16] (narrow) %v2426_v27, 16  ;;  %v2471_v14 = vadd.f32 %v3589_v11, %v4838_v37 }
 0x302   : > { %v2465_v7 = vpop.f32.mrf.mxu0 }
 0x303   : > { %v2466_v49 = vadd.f32 %v4838_v37, %v2465_v7 }
 0x304   : > { %v3592_v43 = vpop.f32.mrf.mxu0 }
 0x305   : > { %2721 = vxpose.xlu0.b32.cont [8/16] (narrow) %v2431_v42, 16  ;;  %v2481_v44 = vadd.f32 %v3592_v43, %v4838_v37 }
 0x306   : > { %v2475_v28 = vpop.f32.mrf.mxu0 }
 0x307   : > { %v2476_v3 = vadd.f32 %v4838_v37, %v2475_v28 }
 0x308   : > { %v3595_v29 = vpop.f32.mrf.mxu0 }
 0x309   : > { %2746 = vxpose.xlu1.b32.start [1/16] (narrow) %v2476_v3, 16  ;;  %2722 = vxpose.xlu0.b32.cont [9/16] (narrow) %v2436_v18, 16  ;;  %v2491_v4 = vadd.f32 %v3595_v29, %v4838_v37 }
 0x30a   : > { %v2485_v8 = vpop.f32.mrf.mxu0 }
 0x30b   : > { %v2486_v57 = vadd.f32 %v4838_v37, %v2485_v8 }
 0x30c   : > { %v3598_v45 = vpop.f32.mrf.mxu0 }
 0x30d   : > { %2747 = vxpose.xlu1.b32.cont [2/16] (narrow) %v2481_v44, 16  ;;  %2723 = vxpose.xlu0.b32.cont [10/16] (narrow) %v2441_v19, 16  ;;  %v2501_v1 = vadd.f32 %v3598_v45, %v4838_v37 }
 0x30e   : > { %v2495_v30 = vpop.f32.mrf.mxu0 }
 0x30f   : > { %v2496_v56 = vadd.f32 %v4838_v37, %v2495_v30 }
 0x310   : > { %v3601_v0 = vpop.f32.mrf.mxu0 }
 0x311   : > { %2748 = vxpose.xlu1.b32.cont [3/16] (narrow) %v2486_v57, 16  ;;  %2724 = vxpose.xlu0.b32.cont [11/16] (narrow) %v2446_v12, 16  ;;  %v2511_v50 = vadd.f32 %v3601_v0, %v4838_v37 }
 0x312   : > { %v2505_v31 = vpop.f32.mrf.mxu0 }
 0x313   : > { %v2506_v60 = vadd.f32 %v4838_v37, %v2505_v31 }
 0x314   : > { %v3604_v46 = vpop.f32.mrf.mxu0 }
 0x315   : > { %2749 = vxpose.xlu1.b32.cont [4/16] (narrow) %v2491_v4, 16  ;;  %2725 = vxpose.xlu0.b32.cont [12/16] (narrow) %v2451_v20, 16  ;;  %v2521_v53 = vadd.f32 %v3604_v46, %v4838_v37 }
 0x316   : > { %v2515_v47 = vpop.f32.mrf.mxu0 }
 0x317   : > { %v2516_v61 = vadd.f32 %v4838_v37, %v2515_v47 }
 0x318   : > { %v3607_v32 = vpop.f32.mrf.mxu0 }
 0x319   : > { %2750 = vxpose.xlu1.b32.cont [5/16] (narrow) %v2496_v56, 16  ;;  %2726 = vxpose.xlu0.b32.cont [13/16] (narrow) %v2456_v5, 16  ;;  %v2531_v54 = vadd.f32 %v3607_v32, %v4838_v37 }
 0x31a   : > { %v2525_v13 = vpop.f32.mrf.mxu0 }
 0x31b   : > { %v2526_v38 = vadd.f32 %v4838_v37, %v2525_v13 }
 0x31c   : > { %v3610_v33 = vpop.f32.mrf.mxu0 }
 0x31d   : > { %2751 = vxpose.xlu1.b32.cont [6/16] (narrow) %v2501_v1, 16  ;;  %2727 = vxpose.xlu0.b32.cont [14/16] (narrow) %v2461_v21, 16  ;;  %v2541_v40 = vadd.f32 %v3610_v33, %v4838_v37 }
 0x31e   : > { %v2535_v9 = vpop.f32.mrf.mxu0 }
 0x31f   : > { %v2536_v25 = vadd.f32 %v4838_v37, %v2535_v9 }
 0x320   : > { %v3613_v22 = vpop.f32.mrf.mxu0 }
 0x321   : > { %2752 = vxpose.xlu1.b32.cont [7/16] (narrow) %v2506_v60, 16  ;;  %2728 = vxpose.xlu0.b32.cont [15/16] (narrow) %v2466_v49, 16  ;;  %v2551_v42 = vadd.f32 %v3613_v22, %v4838_v37 }
 0x322   : > { %v2545_v34 = vpop.f32.mrf.mxu0 }
 0x323   : > { %v2546_v17 = vadd.f32 %v4838_v37, %v2545_v34 }
 0x324   : > { %v3616_v51 = vpop.f32.mrf.mxu0 }
 0x325   : > { %2753 = vxpose.xlu1.b32.cont [8/16] (narrow) %v2511_v50, 16  ;;  %2729 = vxpose.xlu0.b32.end [16/16] (narrow) %v2471_v14, 16  ;;  %v2561_v36 = vadd.f32 %v3616_v51, %v4838_v37 }
 0x326   : > { %v2555_v35 = vpop.f32.mrf.mxu0 }
 0x327   : > { %v2556_v23 = vadd.f32 %v4838_v37, %v2555_v35 }
 0x328   : > { %v3619_v6 = vpop.f32.mrf.mxu0 }
 0x329   : > { %2754 = vxpose.xlu1.b32.cont [9/16] (narrow) %v2516_v61, 16  ;;  %2778 = vxpose.xlu0.b32.start [1/16] (narrow) %v2556_v23, 16  ;;  %v2571_v55 = vadd.f32 %v3619_v6, %v4838_v37 }
 0x32a   : > { %v2565_v52 = vpop.f32.mrf.mxu0 }
 0x32b   : > { %v2566_v59 = vadd.f32 %v4838_v37, %v2565_v52 }
 0x32c   : > { %v3622_v15 = vpop.f32.mrf.mxu0 }
 0x32d   : > { %2755 = vxpose.xlu1.b32.cont [10/16] (narrow) %v2521_v53, 16  ;;  %2779 = vxpose.xlu0.b32.cont [2/16] (narrow) %v2561_v36, 16  ;;  %v2581_v41 = vadd.f32 %v3622_v15, %v4838_v37 }
 0x32e   : > { %v2575_v24 = vpop.f32.mrf.mxu0 }
 0x32f   : > { %v2576_v62 = vadd.f32 %v4838_v37, %v2575_v24 }
 0x330   : > { %v3625_v48 = vpop.f32.mrf.mxu0 }
 0x331   : > { %2756 = vxpose.xlu1.b32.cont [11/16] (narrow) %v2526_v38, 16  ;;  %2780 = vxpose.xlu0.b32.cont [3/16] (narrow) %v2566_v59, 16  ;;  %v2591_v43 = vadd.f32 %v3625_v48, %v4838_v37 }
 0x332   : > { %v2585_v39 = vpop.f32.mrf.mxu0 }
 0x333   : > { %v2586_v27 = vadd.f32 %v4838_v37, %v2585_v39 }
 0x334   : > { %v3628_v10 = vpop.f32.mrf.mxu0 }
 0x335   : > { %2757 = vxpose.xlu1.b32.cont [12/16] (narrow) %v2531_v54, 16  ;;  %2781 = vxpose.xlu0.b32.cont [4/16] (narrow) %v2571_v55, 16  ;;  %v2601_v19 = vadd.f32 %v3628_v10, %v4838_v37 }
 0x336   : > { %v2595_v58 = vpop.f32.mrf.mxu0 }
 0x337   : > { %v2596_v3 = vadd.f32 %v4838_v37, %v2595_v58 }
 0x338   : > { %v3631_v16 = vpop.f32.mrf.mxu0 }
 0x339   : > { %2758 = vxpose.xlu1.b32.cont [13/16] (narrow) %v2536_v25, 16  ;;  %2782 = vxpose.xlu0.b32.cont [5/16] (narrow) %v2576_v62, 16  ;;  %v2611_v0 = vadd.f32 %v3631_v16, %v4838_v37 }
 0x33a   : > { %v2605_v63 = vpop.f32.mrf.mxu0 }
 0x33b   : > { %v2606_v30 = vadd.f32 %v4838_v37, %v2605_v63 }
 0x33c   : > { %v3634_v26 = vpop.f32.mrf.mxu0 }
 0x33d   : > { %2759 = vxpose.xlu1.b32.cont [14/16] (narrow) %v2541_v40, 16  ;;  %2783 = vxpose.xlu0.b32.cont [6/16] (narrow) %v2581_v41, 16  ;;  %v2621_v5 = vadd.f32 %v3634_v26, %v4838_v37 }
 0x33e   : > { %v2615_v2 = vpop.f32.mrf.mxu0 }
 0x33f   : > { %v2616_v4 = vadd.f32 %v4838_v37, %v2615_v2 }
 0x340   : > { %v3637_v11 = vpop.f32.mrf.mxu0 }
 0x341   : > { %2760 = vxpose.xlu1.b32.cont [15/16] (narrow) %v2546_v17, 16  ;;  %2784 = vxpose.xlu0.b32.cont [7/16] (narrow) %v2586_v27, 16  ;;  %v2631_v33 = vadd.f32 %v3637_v11, %v4838_v37 }
 0x342   : > { %v2625_v7 = vpop.f32.mrf.mxu0 }
 0x343   : > { %v2626_v13 = vadd.f32 %v4838_v37, %v2625_v7 }
 0x344   : > { %v3640_v28 = vpop.f32.mrf.mxu0 }
 0x345   : > { %2761 = vxpose.xlu1.b32.end [16/16] (narrow) %v2551_v42, 16  ;;  %2785 = vxpose.xlu0.b32.cont [8/16] (narrow) %v2591_v43, 16  ;;  %v2641_v44 = vadd.f32 %v3640_v28, %v4838_v37 }
 0x346   : > { %v2635_v18 = vpop.f32.mrf.mxu0 }
 0x347   : > { %v2636_v29 = vadd.f32 %v4838_v37, %v2635_v18 }
 0x348   : > { %v3643_v8 = vpop.f32.mrf.mxu0 }
 0x349   : > { %2810 = vxpose.xlu1.b32.start [1/16] (narrow) %v2636_v29, 16  ;;  %2786 = vxpose.xlu0.b32.cont [9/16] (narrow) %v2596_v3, 16  ;;  %v2651_v31 = vadd.f32 %v3643_v8, %v4838_v37 }
 0x34a   : > { %v2645_v45 = vpop.f32.mrf.mxu0 }
 0x34b   : > { %v2646_v12 = vadd.f32 %v4838_v37, %v2645_v45 }
 0x34c   : > { %v3646_v57 = vpop.f32.mrf.mxu0 }
 0x34d   : > { %2811 = vxpose.xlu1.b32.cont [2/16] (narrow) %v2641_v44, 16  ;;  %2787 = vxpose.xlu0.b32.cont [10/16] (narrow) %v2601_v19, 16  ;;  %v2661_v56 = vadd.f32 %v3646_v57, %v4838_v37 }
 0x34e   : > { %v2655_v20 = vpop.f32.mrf.mxu0 }
 0x34f   : > { %v2656_v46 = vadd.f32 %v4838_v37, %v2655_v20 }
 0x350   : > { %v3649_v47 = vpop.f32.mrf.mxu0 }
 0x351   : > { %2812 = vxpose.xlu1.b32.cont [3/16] (narrow) %v2646_v12, 16  ;;  %2788 = vxpose.xlu0.b32.cont [11/16] (narrow) %v2606_v30, 16  ;;  %v2671_v9 = vadd.f32 %v3649_v47, %v4838_v37 }
 0x352   : > { %v2665_v32 = vpop.f32.mrf.mxu0 }
 0x353   : > { %v2666_v21 = vadd.f32 %v4838_v37, %v2665_v32 }
 0x354   : > { %v3652_v1 = vpop.f32.mrf.mxu0 }
 0x355   : > { %2813 = vxpose.xlu1.b32.cont [4/16] (narrow) %v2651_v31, 16  ;;  %2789 = vxpose.xlu0.b32.cont [12/16] (narrow) %v2611_v0, 16  ;;  %v2681_v50 = vadd.f32 %v3652_v1, %v4838_v37 }
 0x356   : > { %v2675_v49 = vpop.f32.mrf.mxu0 }
 0x357   : > { %v2676_v22 = vadd.f32 %v4838_v37, %v2675_v49 }
 0x358   : > { %v3655_v34 = vpop.f32.mrf.mxu0 }
 0x359   : > { %2814 = vxpose.xlu1.b32.cont [5/16] (narrow) %v2656_v46, 16  ;;  %2790 = vxpose.xlu0.b32.cont [13/16] (narrow) %v2616_v4, 16  ;;  %v2691_v23 = vadd.f32 %v3655_v34, %v4838_v37 }
 0x35a   : > { %v2685_v51 = vpop.f32.mrf.mxu0 }
 0x35b   : > { %v2686_v35 = vadd.f32 %v4838_v37, %v2685_v51 }
 0x35c   : > { %v3658_v61 = vpop.f32.mrf.mxu0 }
 0x35d   : > { %2815 = vxpose.xlu1.b32.cont [6/16] (narrow) %v2661_v56, 16  ;;  %2791 = vxpose.xlu0.b32.cont [14/16] (narrow) %v2621_v5, 16  ;;  %v2701_v36 = vadd.f32 %v3658_v61, %v4838_v37 }
 0x35e   : > { %v2695_v6 = vpop.f32.mrf.mxu0 }
 0x35f   : > { %v2696_v52 = vadd.f32 %v4838_v37, %v2695_v6 }
 0x360   : > { %v3661_v53 = vpop.f32.mrf.mxu0 }
 0x361   : > { %2816 = vxpose.xlu1.b32.cont [7/16] (narrow) %v2666_v21, 16  ;;  %2792 = vxpose.xlu0.b32.cont [15/16] (narrow) %v2626_v13, 16  ;;  %v2711_v38 = vadd.f32 %v3661_v53, %v4838_v37 }
 0x362   : > { %v2705_v15 = vpop.f32.mrf.mxu0 }
 0x363   : > { %v2706_v24 = vadd.f32 %v4838_v37, %v2705_v15 }
 0x365   : > { %2817 = vxpose.xlu1.b32.cont [8/16] (narrow) %v2671_v9, 16  ;;  %2793 = vxpose.xlu0.b32.end [16/16] (narrow) %v2631_v33, 16  ;;  %v2730_v60 = vpop.trf.xlu0 }
 0x366   : > { %2842 = vst [vmem:[%s4899_s17] sm:$0xff] %v2730_v60 }
 0x369   : > { %2818 = vxpose.xlu1.b32.cont [9/16] (narrow) %v2676_v22, 16  ;;  %v2731_v14 = vpop.trf.xlu0 }
 0x36a   : > { %2846 = vst [vmem:[%s4899_s17 + $0x20] sm:$0xff] %v2731_v14 }
 0x36d   : > { %2819 = vxpose.xlu1.b32.cont [10/16] (narrow) %v2681_v50, 16 }
 0x371   : > { %2820 = vxpose.xlu1.b32.cont [11/16] (narrow) %v2686_v35, 16 }
 0x375   : > { %2821 = vxpose.xlu1.b32.cont [12/16] (narrow) %v2691_v23, 16 }
 0x379   : > { %2822 = vxpose.xlu1.b32.cont [13/16] (narrow) %v2696_v52, 16 }
 0x37d   : > { %2823 = vxpose.xlu1.b32.cont [14/16] (narrow) %v2701_v36, 16 }
 0x381   : > { %2824 = vxpose.xlu1.b32.cont [15/16] (narrow) %v2706_v24, 16 }
 0x385   : > { %2825 = vxpose.xlu1.b32.end [16/16] (narrow) %v2711_v38, 16  ;;  %v2762_v59 = vpop.trf.xlu1 }
 0x386   : > { %2843 = vst [vmem:[%s4899_s17 + $0x8] sm:$0xff] %v2762_v59 }
 0x389   : > { %v2763_v48 = vpop.trf.xlu1 }
 0x38a   : > { %2847 = vst [vmem:[%s4899_s17 + $0x28] sm:$0xff] %v2763_v48 }
 0x3a5   : > { %v2794_v39 = vpop.trf.xlu0 }
 0x3a6   : > { %2844 = vst [vmem:[%s4899_s17 + $0x10] sm:$0xff] %v2794_v39 }
 0x3a9   : > { %v2795_v54 = vpop.trf.xlu0 }
 0x3aa   : > { %2848 = vst [vmem:[%s4899_s17 + $0x30] sm:$0xff] %v2795_v54 }
 0x3c5   : > { %v2826_v55 = vpop.trf.xlu1 }
 0x3c6   : > { %2845 = vst [vmem:[%s4899_s17 + $0x18] sm:$0xff] %v2826_v55 }
 0x3c9   : > { %v2827_v37 = vpop.trf.xlu1 }
 0x3ca   : > { %2849 = vst [vmem:[%s4899_s17 + $0x38] sm:$0xff] %v2827_v37 }
 0x3cb   : > { %3726 = shalt.err (!%p3723_p3)
}
 0x3cc   : > { %s3727_s13 = scalar_lea.hbm %s4923_s22, 1024  ;;  %s3731_s16 = scalar_lea.hbm %s4975_s7, 2048 }
 0x3cd   : > { %p3728_p4 = scmp.ne.s32.totalorder %s4923_s22, %s3727_s13  ;;  %p3732_p9 = scmp.lt.s32.totalorder %s4923_s22, %s4975_s7 }
 0x3ce   : > { %p3733_p10 = scmp.lt.s32.totalorder %s3731_s16, %s3727_s13 }
 0x3cf   : > { %p3729_p7 = pnand %p3728_p4, %p3858_p5 }
 0x3d0   : > { %p3734_p11 = por %p3733_p10, %p3732_p9 }
 0x3d1   : > { %p3730_p8 = pneg %p3729_p7 }
 0x3d3   : > { %p3735_p12 = pnand %p3734_p11, %p3730_p8 }
 0x3d5   : > { %3738 = shalt.err (!%p3735_p12)
}
 0x3d6   : > { %s3777_s20 = smov 512   ;;  %s3778_s21 = smov 1024  }
 0x3d7   : > { %s3779_s29 = smov 32  }
 0x3d8   : > { %3670 = dma.vmem_to_hbm [thread:$0]  (%p3858_p5), %s4917_s18, 1024, %s4923_s22, %s4928_s23, %s3777_s20, %s3778_s21, %s3779_s29  }
 0x3d9 PF: > { %p3676_p13 = scmp.ge.s32.totalorder %s3773_s27, 2  ;;  %s2879_s28 = sand.u32 1, %s3761_s24  }
 0x3da   : > { %s2880_s8 = scalar_lea.sflag [#allocation3], %s2879_s28 }
 0x3db   : > { %p3673_p0 = pnand %p3676_p13, %p3862_p6 }
 0x3dd   : > { %p3674_p1 = pneg %p3673_p0 }
 0x3df   : > { %3756 = dma.done.wait (%p3674_p1), %s2880_s8, 1024  }
 0x3e0   : > { %3758 = vsyncadd (%p3674_p1), %s2880_s8, 4294966272  ;;  %p17_p2 = scmp.ge.s32.totalorder %s3845_s30, 4   ;;  %s4999_s24 = smov %s3765_s25 }
 0x3e1   : > { %s5000_s25 = smov %s3769_s26  ;;  %s5001_s26 = smov %s3856_s10 }
 0x3e2   : > { %s5002_s27 = smov %s3845_s30  ;;  %19 = sbr.rel (!%p17_p2) target bundleno = 3 (0x3), region = 83 }
 0x3e7   :  { %2885 = vsyncpa [#allocation3], 1 }
 0x3e8   :  { %2887 = vsyncpa [#allocation3 + $0x1], 1 }

</bundles_post_ra>
